<compile_context>
chip_gen: v7x
topology: tpu7x:2x2x1
jax: 0.10.0
libtpu: 0.0.40
codegen_flags: <defaults>
</compile_context>

<pallas_src>
import functools

import jax
import jax.numpy as jnp
from jax import lax
from jax.experimental import pallas as pl
from jax.experimental.pallas import tpu as pltpu

# ----------------------------- model config ---------------------------------
INPUT_SETS = {"team": ["red", "blue", "green", "yellow", "purple"]}   # Embedding(5, 100)
SETS = {"action": ["a0", "a1", "a2", "a3", "a4", "a5", "a6"],          # Linear(300, 7)
        "phase": ["p0", "p1", "p2", "p3"]}                             # Linear(300, 4)
CNN_EMBED_DIM = 300
EPS = 1e-5
IMG_H, IMG_W, NC = 144, 256, 3            # 144 x 256 -> CNN output 512 x 8 x 15


# ----------------------------- helpers ---------------------------------------
@functools.lru_cache(maxsize=1)
def _vmem_capacity_bytes():
    try:
        return int(pltpu.get_tpu_info().vmem_capacity_bytes)
    except Exception:
        return 64 * 1024 * 1024


def _vmem_limit_bytes():
    """Generation-aware scoped-VMEM budget (v7x only has 64 MiB per TensorCore)."""
    return min(3 * _vmem_capacity_bytes() // 4, 56 * 1024 * 1024)


def _row_chunk_bytes():
    """Per-grid-step conv-row chunk: ~4 MiB on 128 MiB-VMEM parts, ~1.5 MiB on v7x."""
    return 4 * 1024 * 1024 if _vmem_capacity_bytes() >= 100 * 1024 * 1024 else 3 * 512 * 1024


def _im2col(x, kh, kw):
    """(B, H, W, C) -> (B, H-kh+1, W-kw+1, kh*kw*C), tap-major (ky, kx, c) order."""
    b, h, w, c = x.shape
    ho, wo = h - kh + 1, w - kw + 1
    cols = [x[:, ky:ky + ho, kx:kx + wo, :] for ky in range(kh) for kx in range(kw)]
    return jnp.concatenate(cols, axis=-1)


# ----------------------------- Pallas kernels --------------------------------
def _conv_bn_relu_pool_kernel(x_ref, w_ref, s_ref, b_ref, o_ref, pool_scr, *,
                              kh, kw, cin, wout, ht, n_inner, pool, fold, h_blocked):
    """Stride-1 conv (kh shifted MXU matmuls, kx folded into K) + folded BN +
    ReLU (+ fused 2x2 max-pool).

    x_ref: (1, Hp, Wp, Cin) bf16; full padded image for conv1-5, an H-block for
           the (1x1 after im2col) conv0.
    w_ref: (kh, kw*Cin, Cout) bf16; s_ref / b_ref: (1, Cout) f32 folded BN.
    o_ref: (1, hb[/2], wout[/2], Cout) bf16 output block for this (batch, row
           block); pool_scr: f32 VMEM scratch for the W-direction 2x2 pool.
    Each grid step covers hb = n_inner*ht conv rows; per inner iteration one
    f32 accumulator of M = ht*wout rows is built from kh bf16 dots.
    """
    kc = w_ref.shape[1]                     # kw * cin
    cout = w_ref.shape[2]
    scale = s_ref[...]                      # (1, cout) broadcasts over rows
    bias = b_ref[...]
    hb = n_inner * ht
    row0 = 0 if h_blocked else pl.program_id(1) * hb

    @pl.loop(0, n_inner)
    def _(it):
        r0 = row0 + it * ht
        acc = jnp.zeros((ht * wout, cout), jnp.float32)
        for ky in range(kh):
            # One aligned VMEM load per tap-row; kx handled in-register.
            stripe = x_ref[0, pl.ds(r0 + ky, ht), :, :]          # (ht, Wp, cin) bf16
            if kw == 1:
                acc = acc + jnp.dot(stripe.reshape(ht * wout, kc), w_ref[ky],
                                    preferred_element_type=jnp.float32)
            elif fold:
                # In-register im2col along W: one dot of K = kw*cin per ky.
                patch = jnp.concatenate(
                    [stripe[:, kx:kx + wout, :] for kx in range(kw)], axis=-1)
                acc = acc + jnp.dot(patch.reshape(ht * wout, kc), w_ref[ky],
                                    preferred_element_type=jnp.float32)
            else:
                # cin not lane-aligned (conv1): keep per-kx dots of K = cin.
                for kx in range(kw):
                    acc = acc + jnp.dot(
                        stripe[:, kx:kx + wout, :].reshape(ht * wout, cin),
                        w_ref[ky, kx * cin:(kx + 1) * cin, :],
                        preferred_element_type=jnp.float32)
        y = jnp.maximum(acc * scale + bias, 0.0)                  # (ht*wout, cout) f32
        if pool:                                                  # ht is even here
            h2 = ht // 2
            # H-direction pool in-register (static contiguous row-block slices).
            for t in range(h2):
                pool_scr[t * wout:(t + 1) * wout, :] = jnp.maximum(
                    y[(2 * t) * wout:(2 * t + 1) * wout, :],
                    y[(2 * t + 1) * wout:(2 * t + 2) * wout, :])
            # W-direction pool via stride-2 sublane reads of the VMEM scratch.
            half = (h2 * wout) // 2
            pooled = jnp.maximum(pool_scr[pl.ds(0, half, 2), :],
                                 pool_scr[pl.ds(1, half, 2), :])
            o_ref[0, pl.ds(it * h2, h2), :, :] = (
                pooled.reshape(h2, wout // 2, cout).astype(o_ref.dtype))
        else:
            o_ref[0, pl.ds(it * ht, ht), :, :] = (
                y.reshape(ht, wout, cout).astype(o_ref.dtype))


def _linear_bn_relu_single_kernel(x_ref, w_ref, s_ref, b_ref, o_ref):
    # Single-shot x @ W (no K tiling): no accumulator scratch / guards needed.
    y = jnp.dot(x_ref[...], w_ref[...], preferred_element_type=jnp.float32)
    o_ref[...] = jnp.maximum(y * s_ref[...] + b_ref[...], 0.0).astype(o_ref.dtype)


def _linear_bn_relu_tiled_kernel(x_ref, w_ref, s_ref, b_ref, o_ref, acc_ref):
    # K-tiled x @ W accumulation (grid = (n_split, k_steps)); on the last K step
    # apply folded BN scale/bias + ReLU.
    k = pl.program_id(1)

    @pl.when(k == 0)
    def _():
        acc_ref[...] = jnp.zeros_like(acc_ref)

    acc_ref[...] += jnp.dot(x_ref[...], w_ref[...], preferred_element_type=jnp.float32)

    @pl.when(k == pl.num_programs(1) - 1)
    def _():
        o_ref[...] = jnp.maximum(acc_ref[...] * s_ref[...] + b_ref[...],
                                 0.0).astype(o_ref.dtype)


def _fc2_heads_kernel(x_ref, w2_ref, s2_ref, b2_ref, wh_ref, bh_ref, o_ref, *, seg):
    """fc2 + folded bn2 + ReLU + all output heads + per-head log_softmax, fused."""
    h = jnp.dot(x_ref[...], w2_ref[...], preferred_element_type=jnp.float32)
    h = jnp.maximum(h * s2_ref[...] + b2_ref[...], 0.0)
    logits = jnp.dot(h, wh_ref[...], preferred_element_type=jnp.float32) + bh_ref[...]
    col = lax.broadcasted_iota(jnp.int32, logits.shape, 1)
    out = jnp.zeros_like(logits)
    for start, size in seg:                                  # static (2 heads)
        mask = (col >= start) & (col < start + size)
        m = jnp.max(jnp.where(mask, logits, -jnp.inf), axis=-1, keepdims=True)
        e = jnp.exp(jnp.where(mask, logits - m, -jnp.inf))
        lse = m + jnp.log(jnp.sum(e, axis=-1, keepdims=True))
        out = jnp.where(mask, logits - lse, out)
    o_ref[...] = out


# ----------------------------- wrappers ---------------------------------------
def conv_bn_relu_pool(x, w, scale, bias, *, pool, h_blocked=False):
    """NHWC stride-1 conv + folded-BN + ReLU, optionally fused 2x2 max-pool.

    x: (B, Hp, Wp, Cin) bf16 padded input; w: (kh, kw*Cin, Cout) bf16.
    h_blocked requires kh == 1 (no halo), used for the im2col'd conv0.
    """
    b, hp, wp, cin = x.shape
    kh, kc, cout = w.shape
    kw = kc // cin
    assert kw * cin == kc
    assert not h_blocked or kh == 1
    hout, wout = hp - kh + 1, wp - kw + 1

    # ht conv rows per accumulator (M = ht*wout rows per dot), acc <= ~384 KiB.
    row_bytes = wout * cout * 4
    cap = max(2, (384 * 1024) // row_bytes)
    ht = 1
    for cand in range(2, min(hout, cap) + 1):
        if hout % cand == 0 and (cand % 2 == 0 or not pool):
            ht = cand
    if pool:
        assert ht % 2 == 0 and hout % 2 == 0 and wout % 2 == 0

    # hb = n_inner*ht conv rows per grid step (generation-aware chunk size).
    blocks = hout // ht
    n_inner = max(1, min(blocks, _row_chunk_bytes() // (row_bytes * ht)))
    while blocks % n_inner:
        n_inner -= 1
    hb = n_inner * ht
    grid_rows = blocks // n_inner

    fold = (kw == 1) or (cin % 128 == 0)     # conv1 (cin=64) keeps per-kx dots

    if pool:
        out_shape = (b, hout // 2, wout // 2, cout)
        out_block = (1, hb // 2, wout // 2, cout)
        scr_shape = ((ht // 2) * wout, cout)
    else:
        out_shape = (b, hout, wout, cout)
        out_block = (1, hb, wout, cout)
        scr_shape = (8, 128)                 # unused dummy scratch

    if h_blocked:
        x_spec = pl.BlockSpec((1, hb, wp, cin), lambda bi, ci: (bi, ci, 0, 0))
    else:
        x_spec = pl.BlockSpec((1, hp, wp, cin), lambda bi, ci: (bi, 0, 0, 0))

    kernel = functools.partial(_conv_bn_relu_pool_kernel, kh=kh, kw=kw, cin=cin,
                               wout=wout, ht=ht, n_inner=n_inner, pool=pool,
                               fold=fold, h_blocked=h_blocked)
    return pl.pallas_call(
        kernel,
        out_shape=jax.ShapeDtypeStruct(out_shape, jnp.bfloat16),
        grid=(b, grid_rows),
        in_specs=[
            x_spec,
            pl.BlockSpec((kh, kc, cout), lambda bi, ci: (0, 0, 0)),
            pl.BlockSpec((1, cout), lambda bi, ci: (0, 0)),
            pl.BlockSpec((1, cout), lambda bi, ci: (0, 0)),
        ],
        out_specs=pl.BlockSpec(out_block, lambda bi, ci: (bi, ci, 0, 0)),
        scratch_shapes=[pltpu.VMEM(scr_shape, jnp.float32)],
        compiler_params=pltpu.CompilerParams(
            dimension_semantics=("parallel", "parallel"),
            vmem_limit_bytes=_vmem_limit_bytes(),
        ),
    )(x, w, scale, bias)


def linear_bn_relu(x, w, scale, bias, *, tk=None, n_split=1, out_dtype=jnp.float32):
    bsz, kdim = x.shape
    n = w.shape[1]
    if tk is None or kdim <= tk:
        # Single-shot path (conv6): no accumulator scratch, no init/finalize guards.
        return pl.pallas_call(
            _linear_bn_relu_single_kernel,
            out_shape=jax.ShapeDtypeStruct((bsz, n), out_dtype),
            grid=(1,),
            in_specs=[
                pl.BlockSpec((bsz, kdim), lambda i: (0, 0)),
                pl.BlockSpec((kdim, n), lambda i: (0, 0)),
                pl.BlockSpec((1, n), lambda i: (0, 0)),
                pl.BlockSpec((1, n), lambda i: (0, 0)),
            ],
            out_specs=pl.BlockSpec((bsz, n), lambda i: (0, 0)),
            compiler_params=pltpu.CompilerParams(
                dimension_semantics=("arbitrary",),
                vmem_limit_bytes=_vmem_limit_bytes(),
            ),
        )(x, w, scale, bias)

    assert kdim % tk == 0 and n % n_split == 0
    nb = n // n_split
    return pl.pallas_call(
        _linear_bn_relu_tiled_kernel,
        out_shape=jax.ShapeDtypeStruct((bsz, n), out_dtype),
        grid=(n_split, kdim // tk),
        in_specs=[
            pl.BlockSpec((bsz, tk), lambda ni, k: (0, k)),
            pl.BlockSpec((tk, nb), lambda ni, k: (k, ni)),
            pl.BlockSpec((1, nb), lambda ni, k: (0, ni)),
            pl.BlockSpec((1, nb), lambda ni, k: (0, ni)),
        ],
        out_specs=pl.BlockSpec((bsz, nb), lambda ni, k: (0, ni)),
        scratch_shapes=[pltpu.VMEM((bsz, nb), jnp.float32)],
        compiler_params=pltpu.CompilerParams(
            dimension_semantics=("parallel", "arbitrary"),
            vmem_limit_bytes=_vmem_limit_bytes(),
        ),
    )(x, w, scale, bias)


def fc2_heads(x, w2, s2, b2, wh, bh, seg):
    bsz = x.shape[0]
    nout = wh.shape[1]
    kernel = functools.partial(_fc2_heads_kernel, seg=tuple(seg))
    return pl.pallas_call(
        kernel,
        out_shape=jax.ShapeDtypeStruct((bsz, nout), jnp.float32),
        grid=(1,),
        in_specs=[
            pl.BlockSpec(x.shape, lambda i: (0, 0)),
            pl.BlockSpec(w2.shape, lambda i: (0, 0)),
            pl.BlockSpec(s2.shape, lambda i: (0, 0)),
            pl.BlockSpec(b2.shape, lambda i: (0, 0)),
            pl.BlockSpec(wh.shape, lambda i: (0, 0)),
            pl.BlockSpec(bh.shape, lambda i: (0, 0)),
        ],
        out_specs=pl.BlockSpec((bsz, nout), lambda i: (0, 0)),
        compiler_params=pltpu.CompilerParams(
            dimension_semantics=("arbitrary",),
            vmem_limit_bytes=_vmem_limit_bytes(),
        ),
    )(x, w2, s2, b2, wh, bh)


# ----------------------------- parameters -------------------------------------
def init_params(key):
    ks = [3, 3, 3, 3, 3, 3, 2]
    nm = [64, 128, 256, 256, 512, 512, 512]
    bn_layers = {2, 4, 6}
    pool_after = {0, 1, 3, 5}

    keys = iter(jax.random.split(key, 64))

    def fold_bn(b, cout, with_bn):
        if with_bn:
            gamma = 0.8 + 0.4 * jax.random.uniform(next(keys), (cout,), jnp.float32)
            beta = 0.1 * jax.random.normal(next(keys), (cout,), jnp.float32)
            rmean = 0.1 * jax.random.normal(next(keys), (cout,), jnp.float32)
            rvar = 0.8 + 0.4 * jax.random.uniform(next(keys), (cout,), jnp.float32)
            sg = gamma / jnp.sqrt(rvar + EPS)
            return sg.reshape(1, cout), ((b - rmean) * sg + beta).reshape(1, cout)
        return jnp.ones((1, cout), jnp.float32), b.reshape(1, cout)

    cnn = []
    cin = NC
    for i in range(7):
        cout, k = nm[i], ks[i]
        fan_in = k * k * cin
        w = jax.random.normal(next(keys), (k, k, cin, cout), jnp.float32) / jnp.sqrt(fan_in)
        b = 0.01 * jax.random.normal(next(keys), (cout,), jnp.float32)
        scale, bias = fold_bn(b, cout, i in bn_layers)
        if i == 0:
            w = w.reshape(1, k * k * cin, cout)      # all taps folded into K (im2col glue)
        elif i == 6:
            w = w.reshape(k * k * cin, cout)         # conv6 runs as one matmul
        else:
            w = w.reshape(k, k * cin, cout)          # kx folded into K, per-ky dots
        w = w.astype(jnp.bfloat16)                   # bf16 operands, f32 accumulate
        cnn.append(dict(w=w, scale=scale, bias=bias, pool=(i in pool_after)))
        cin = cout

    def linear(kin, kout, with_bn):
        w = jax.random.normal(next(keys), (kin, kout), jnp.float32) / jnp.sqrt(kin)
        b = 0.01 * jax.random.normal(next(keys), (kout,), jnp.float32)
        s, bb = fold_bn(b, kout, with_bn)
        return w, s, bb

    fc1_w, fc1_s, fc1_b = linear(512 * 8 * 15, 256, True)          # fc1 + bn1
    # Pre-permute fc1 rows from torch's NCHW flatten order (c*120 + y*15 + x)
    # to the NHWC flatten order ((y*15 + x)*512 + c) that the Pallas pipeline
    # produces, so no transpose is needed before the flatten.  Stored bf16.
    perm = (jnp.arange(512)[None, :] * 120 + jnp.arange(120)[:, None]).reshape(-1)
    fc1_w = fc1_w[perm].astype(jnp.bfloat16)

    emb = {k: 0.1 * jax.random.normal(next(keys), (len(v), 100), jnp.float32)
           for k, v in INPUT_SETS.items()}
    in_len = 100 * len(INPUT_SETS)
    fc2_w, fc2_s, fc2_b = linear(256 + in_len, CNN_EMBED_DIM, True)  # fc2 + bn2

    head_ws, head_bs = [], []
    for k, v in SETS.items():
        hw = jax.random.normal(next(keys), (CNN_EMBED_DIM, len(v)), jnp.float32) / jnp.sqrt(CNN_EMBED_DIM)
        hb = 0.01 * jax.random.normal(next(keys), (len(v),), jnp.float32)
        head_ws.append(hw)
        head_bs.append(hb)
    heads_w = jnp.concatenate(head_ws, axis=1)                      # (300, 11)
    heads_b = jnp.concatenate(head_bs, axis=0).reshape(1, -1)       # (1, 11)

    return dict(cnn=cnn, fc1_w=fc1_w, fc1_s=fc1_s, fc1_b=fc1_b, emb=emb,
                fc2_w=fc2_w, fc2_s=fc2_s, fc2_b=fc2_b,
                heads_w=heads_w, heads_b=heads_b)


# ----------------------------- forward -----------------------------------------
def game_norm_cnn_forward(params, x):
    """x: dict with x['image'] NCHW float32 image and int indices for INPUT_SETS keys."""
    img = jnp.transpose(x["image"], (0, 2, 3, 1)).astype(jnp.bfloat16)   # NCHW -> NHWC
    cnn = params["cnn"]

    # conv0: taps folded into the contraction dim (K = 3*3*3 = 27) + fused pool.
    # Input is H-blocked in the BlockSpec (1x1 conv after im2col -> no halo).
    h = jnp.pad(img, ((0, 0), (1, 1), (1, 1), (0, 0)))
    h = _im2col(h, 3, 3)
    h = conv_bn_relu_pool(h, cnn[0]["w"], cnn[0]["scale"], cnn[0]["bias"],
                          pool=True, h_blocked=True)

    # conv1..conv5 (3x3, pad 1), pool fused after 1, 3, 5.
    for i in (1, 2, 3, 4, 5):
        layer = cnn[i]
        hpad = jnp.pad(h, ((0, 0), (1, 1), (1, 1), (0, 0)))
        h = conv_bn_relu_pool(hpad, layer["w"], layer["scale"], layer["bias"],
                              pool=layer["pool"])

    # conv6 (2x2, no pad, BN): one (B*8*15, 2048) x (2048, 512) bf16 matmul.
    b = h.shape[0]
    h6 = _im2col(h, 2, 2).reshape(b * 8 * 15, 2 * 2 * 512)
    h6 = linear_bn_relu(h6, cnn[6]["w"], cnn[6]["scale"], cnn[6]["bias"],
                        out_dtype=jnp.bfloat16)

    # NHWC flatten (fc1_w rows were pre-permuted to match torch's NCHW flatten).
    feat = h6.reshape(b, 512 * 8 * 15)
    # F.dropout(p=0.3) is identity in eval mode.
    # fc1: K-tiled, N split in two "parallel" column blocks (v7x megacore).
    h = linear_bn_relu(feat, params["fc1_w"], params["fc1_s"], params["fc1_b"],
                       tk=12288, n_split=2)

    # Embedding gather is plain-JAX glue (tiny).
    embs = [jnp.take(params["emb"][k], x[k].astype(jnp.int32), axis=0) for k in INPUT_SETS]
    h = jnp.concatenate([h] + embs, axis=1)

    # fc2 + bn2 + relu + all heads + per-head log_softmax in one kernel.
    seg, off = [], 0
    for k, v in SETS.items():
        seg.append((off, len(v)))
        off += len(v)
    out_cat = fc2_heads(h, params["fc2_w"], params["fc2_s"], params["fc2_b"],
                        params["heads_w"], params["heads_b"], seg)

    outs, off = {}, 0
    for k, v in SETS.items():
        outs[k] = out_cat[:, off:off + len(v)]
        off += len(v)
    return outs


# ----------------------------- driver -------------------------------------------
if __name__ == "__main__":
    root = jax.random.PRNGKey(0)
    k_params, k_img = jax.random.split(root)
    params = init_params(k_params)

    B = 2
    x = {
        "image": jax.random.normal(k_img, (B, NC, IMG_H, IMG_W), jnp.float32),
        "team": jnp.array([1, 3], dtype=jnp.int32),
    }

    outs = game_norm_cnn_forward(params, x)
    outs = jax.block_until_ready(outs)

    # sanity: log_softmax rows must exponentiate to probabilities summing to 1
    for k, v in outs.items():
        assert v.shape == (B, len(SETS[k])), (k, v.shape)
        s = jnp.sum(jnp.exp(v), axis=-1)
        assert bool(jnp.all(jnp.abs(s - 1.0) < 1e-3)), (k, s)
        assert bool(jnp.all(jnp.isfinite(v))), k

    print("KERNEL_OK")
</pallas_src>

<mosaic_0001>
module attributes {stable_mosaic.version = 11 : i64} {
  func.func @_conv_bn_relu_pool_kernel(%arg0: i32, %arg1: i32, %arg2: memref<1x24x256x27xbf16, #tpu.memory_space<vmem>>, %arg3: memref<1x27x64xbf16, #tpu.memory_space<vmem>>, %arg4: memref<1x64xf32, #tpu.memory_space<vmem>>, %arg5: memref<1x64xf32, #tpu.memory_space<vmem>>, %arg6: memref<1x12x128x64xbf16, #tpu.memory_space<vmem>>, %arg7: memref<768x64xf32, #tpu.memory_space<vmem>>) attributes {dimension_semantics = [#tpu.dimension_semantics<parallel>, #tpu.dimension_semantics<parallel>], iteration_bounds = array<i64: 2, 6>, scalar_prefetch = 0 : i64, scratch_operands = 1 : i64, tpu.core_type = #tpu.core_type<tc>, window_params = [{transform_indices = @transform_0, window_bounds = array<i64: 1, 24, 256, 27>}, {pipeline_mode = #tpu.pipeline_mode<synchronous>, transform_indices = @transform_1, window_bounds = array<i64: 1, 27, 64>}, {pipeline_mode = #tpu.pipeline_mode<synchronous>, transform_indices = @transform_2, window_bounds = array<i64: 1, 64>}, {pipeline_mode = #tpu.pipeline_mode<synchronous>, transform_indices = @transform_3, window_bounds = array<i64: 1, 64>}, {transform_indices = @transform_4, window_bounds = array<i64: 1, 12, 128, 64>}]} {
    %c0 = arith.constant 0 : index
    %c0_0 = arith.constant 0 : index
    %0 = vector.load %arg4[%c0, %c0_0] : memref<1x64xf32, #tpu.memory_space<vmem>>, vector<1x64xf32>
    %c0_1 = arith.constant 0 : index
    %c0_2 = arith.constant 0 : index
    %1 = vector.load %arg5[%c0_1, %c0_2] : memref<1x64xf32, #tpu.memory_space<vmem>>, vector<1x64xf32>
    %c0_i32 = arith.constant 0 : i32
    %c4_i32 = arith.constant 4 : i32
    %2 = arith.addi %c0_i32, %c4_i32 : i32
    %c1_i32 = arith.constant 1 : i32
    scf.for %arg8 = %c0_i32 to %2 step %c1_i32  : i32 {
      %c1_i32_4 = arith.constant 1 : i32
      %3 = arith.muli %arg8, %c1_i32_4 : i32
      %c0_i32_5 = arith.constant 0 : i32
      %4 = arith.addi %c0_i32_5, %3 : i32
      %c6_i32 = arith.constant 6 : i32
      %5 = arith.muli %4, %c6_i32 : i32
      %c0_i32_6 = arith.constant 0 : i32
      %6 = arith.addi %c0_i32_6, %5 : i32
      %cst = arith.constant 0.000000e+00 : f32
      %7 = vector.broadcast %cst : f32 to vector<1536x64xf32>
      %c0_i32_7 = arith.constant 0 : i32
      %8 = arith.addi %6, %c0_i32_7 : i32
      %c0_8 = arith.constant 0 : index
      %9 = arith.index_cast %8 : i32 to index
      %c0_9 = arith.constant 0 : index
      %c0_10 = arith.constant 0 : index
      %10 = vector.load %arg2[%c0_8, %9, %c0_9, %c0_10] : memref<1x24x256x27xbf16, #tpu.memory_space<vmem>>, vector<1x6x256x27xbf16>
      %11 = vector.shape_cast %10 : vector<1x6x256x27xbf16> to vector<6x256x27xbf16>
      %12 = vector.shape_cast %11 : vector<6x256x27xbf16> to vector<1536x27xbf16>
      %c0_11 = arith.constant 0 : index
      %c0_12 = arith.constant 0 : index
      %c0_13 = arith.constant 0 : index
      %13 = vector.load %arg3[%c0_11, %c0_12, %c0_13] : memref<1x27x64xbf16, #tpu.memory_space<vmem>>, vector<1x27x64xbf16>
      %14 = vector.shape_cast %13 : vector<1x27x64xbf16> to vector<27x64xbf16>
      %cst_14 = arith.constant dense<0.000000e+00> : vector<1536x64xf32>
      %15 = tpu.matmul %12, %14, %cst_14 {dimension_numbers = #tpu.dot_dimension_numbers<[1], [0], [0], [1], [0, 0, 1, 1], [], []>} : vector<1536x27xbf16>, vector<27x64xbf16>, vector<1536x64xf32> -> vector<1536x64xf32>
      %16 = arith.addf %7, %15 : vector<1536x64xf32>
      %17 = vector.broadcast %0 : vector<1x64xf32> to vector<1536x64xf32>
      %18 = arith.mulf %16, %17 : vector<1536x64xf32>
      %19 = vector.broadcast %1 : vector<1x64xf32> to vector<1536x64xf32>
      %20 = arith.addf %18, %19 : vector<1536x64xf32>
      %cst_15 = arith.constant 0.000000e+00 : f32
      %21 = vector.broadcast %cst_15 : f32 to vector<1536x64xf32>
      %22 = arith.maximumf %20, %21 : vector<1536x64xf32>
      %23 = vector.extract_strided_slice %22 {offsets = [0, 0], sizes = [256, 64], strides = [1, 1]} : vector<1536x64xf32> to vector<256x64xf32>
      %24 = vector.extract_strided_slice %22 {offsets = [256, 0], sizes = [256, 64], strides = [1, 1]} : vector<1536x64xf32> to vector<256x64xf32>
      %25 = arith.maximumf %23, %24 : vector<256x64xf32>
      %c0_16 = arith.constant 0 : index
      %c0_17 = arith.constant 0 : index
      %26 = vector.load %arg7[%c0_16, %c0_17] : memref<768x64xf32, #tpu.memory_space<vmem>>, vector<256x64xf32>
      tpu.vector_store %arg7[%c0_16, %c0_17], %25 {strides = array<i32>} : memref<768x64xf32, #tpu.memory_space<vmem>>, vector<256x64xf32>,
      %27 = vector.extract_strided_slice %22 {offsets = [512, 0], sizes = [256, 64], strides = [1, 1]} : vector<1536x64xf32> to vector<256x64xf32>
      %28 = vector.extract_strided_slice %22 {offsets = [768, 0], sizes = [256, 64], strides = [1, 1]} : vector<1536x64xf32> to vector<256x64xf32>
      %29 = arith.maximumf %27, %28 : vector<256x64xf32>
      %c256 = arith.constant 256 : index
      %c0_18 = arith.constant 0 : index
      %30 = vector.load %arg7[%c256, %c0_18] : memref<768x64xf32, #tpu.memory_space<vmem>>, vector<256x64xf32>
      tpu.vector_store %arg7[%c256, %c0_18], %29 {strides = array<i32>} : memref<768x64xf32, #tpu.memory_space<vmem>>, vector<256x64xf32>,
      %31 = vector.extract_strided_slice %22 {offsets = [1024, 0], sizes = [256, 64], strides = [1, 1]} : vector<1536x64xf32> to vector<256x64xf32>
      %32 = vector.extract_strided_slice %22 {offsets = [1280, 0], sizes = [256, 64], strides = [1, 1]} : vector<1536x64xf32> to vector<256x64xf32>
      %33 = arith.maximumf %31, %32 : vector<256x64xf32>
      %c512 = arith.constant 512 : index
      %c0_19 = arith.constant 0 : index
      %34 = vector.load %arg7[%c512, %c0_19] : memref<768x64xf32, #tpu.memory_space<vmem>>, vector<256x64xf32>
      tpu.vector_store %arg7[%c512, %c0_19], %33 {strides = array<i32>} : memref<768x64xf32, #tpu.memory_space<vmem>>, vector<256x64xf32>,
      %c0_20 = arith.constant 0 : index
      %c0_21 = arith.constant 0 : index
      %35 = tpu.strided_load %arg7[%c0_20, %c0_21] {strides = array<i32: 2, 1>} : memref<768x64xf32, #tpu.memory_space<vmem>>, vector<384x64xf32>
      %c1 = arith.constant 1 : index
      %c0_22 = arith.constant 0 : index
      %36 = tpu.strided_load %arg7[%c1, %c0_22] {strides = array<i32: 2, 1>} : memref<768x64xf32, #tpu.memory_space<vmem>>, vector<384x64xf32>
      %37 = arith.maximumf %35, %36 : vector<384x64xf32>
      %38 = vector.shape_cast %37 : vector<384x64xf32> to vector<3x128x64xf32>
      %39 = arith.truncf %38 : vector<3x128x64xf32> to vector<3x128x64xbf16>
      %c3_i32 = arith.constant 3 : i32
      %40 = arith.muli %4, %c3_i32 : i32
      %c0_23 = arith.constant 0 : index
      %41 = arith.index_cast %40 : i32 to index
      %c0_24 = arith.constant 0 : index
      %c0_25 = arith.constant 0 : index
      %42 = vector.load %arg6[%c0_23, %41, %c0_24, %c0_25] : memref<1x12x128x64xbf16, #tpu.memory_space<vmem>>, vector<1x3x128x64xbf16>
      %43 = vector.shape_cast %42 : vector<1x3x128x64xbf16> to vector<3x128x64xbf16>
      %44 = vector.shape_cast %39 : vector<3x128x64xbf16> to vector<1x3x128x64xbf16>
      tpu.vector_store %arg6[%c0_23, %41, %c0_24, %c0_25], %44 {strides = array<i32>} : memref<1x12x128x64xbf16, #tpu.memory_space<vmem>>, vector<1x3x128x64xbf16>,
    }
    %c4_i32_3 = arith.constant 4 : i32
    return
  }
  func.func @transform_0(%arg0: i32, %arg1: i32) -> (i32, i32, i32, i32) {
    %c0_i32 = arith.constant 0 : i32
    %c0_i32_0 = arith.constant 0 : i32
    %c0_i32_1 = arith.constant 0 : i32
    return %arg0, %arg1, %c0_i32, %c0_i32_0 : i32, i32, i32, i32
  }
  func.func @transform_1(%arg0: i32, %arg1: i32) -> (i32, i32, i32) {
    %c0_i32 = arith.constant 0 : i32
    %c0_i32_0 = arith.constant 0 : i32
    %c0_i32_1 = arith.constant 0 : i32
    %c0_i32_2 = arith.constant 0 : i32
    return %c0_i32, %c0_i32_0, %c0_i32_1 : i32, i32, i32
  }
  func.func @transform_2(%arg0: i32, %arg1: i32) -> (i32, i32) {
    %c0_i32 = arith.constant 0 : i32
    %c0_i32_0 = arith.constant 0 : i32
    %c0_i32_1 = arith.constant 0 : i32
    return %c0_i32, %c0_i32_0 : i32, i32
  }
  func.func @transform_3(%arg0: i32, %arg1: i32) -> (i32, i32) {
    %c0_i32 = arith.constant 0 : i32
    %c0_i32_0 = arith.constant 0 : i32
    %c0_i32_1 = arith.constant 0 : i32
    return %c0_i32, %c0_i32_0 : i32, i32
  }
  func.func @transform_4(%arg0: i32, %arg1: i32) -> (i32, i32, i32, i32) {
    %c0_i32 = arith.constant 0 : i32
    %c0_i32_0 = arith.constant 0 : i32
    %c0_i32_1 = arith.constant 0 : i32
    return %arg0, %arg1, %c0_i32, %c0_i32_0 : i32, i32, i32, i32
  }
}

</mosaic_0001>

<bundles_post_ra>
// kernel: tpu_custom_call.1
= control target key start
LH: loop header
LB: loop body
LE: loop exit
PB: predicated region body
PF: predicated region fallthrough
CT: control target
= control target key end

     0   :  { %9 = vsyncpa [#allocation4], 0  ;;  %s5867_s0 = inlined_call_operand.hbm [shape: bf16[2,144,256,27], index: 0, kind: input, shape index: {}]   ;;  %s5868_s1 = inlined_call_operand.vmem [shape: bf16[1,27,64], index: 1, kind: input, shape index: {}]   ;;  %s5869_s2 = inlined_call_operand.vmem [shape: f32[1,64], index: 2, kind: input, shape index: {}]   ;;  %s5870_s3 = inlined_call_operand.vmem [shape: f32[1,64], index: 3, kind: input, shape index: {}]   ;;  %s5871_s4 = inlined_call_operand.vmem [shape: bf16[2,72,128,64], index: 4, kind: output, shape index: {}]  }
   0x1   :  { %11 = vsyncpa [#allocation4 + $0x1], 0  ;;  %s4351_s15 = smov 0   ;;  %s4353_s16 = smov 0  }
   0x2   :  { %s4355_s17 = smov 0   ;;  %s4357_s18 = smov 0  }
   0x3   :  { %s4359_s19 = smov 0   ;;  %s4361_s20 = smov 0  }
   0x4   :  { %s4363_s21 = smov 0   ;;  %s4365_s22 = smov 0  }
   0x5 LB: > { %s3424_s23 = sadd.s32 4294967295, %s4316_s22   ;;  %s26_s24 = sadd.s32 1, %s4308_s20  ;;  %s4316_s22 = sphi %s4365_s22, %s17_s22   ;;  %s4312_s21 = sphi %s4363_s21, %s6060_s21   ;;  %s4308_s20 = sphi %s4361_s20, %s6059_s20   ;;  %s4304_s19 = sphi %s4359_s19, %s6058_s19   ;;  %s4300_s18 = sphi %s4357_s18, %s6057_s18   ;;  %s4296_s17 = sphi %s4355_s17, %s6056_s17   ;;  %s4292_s16 = sphi %s4353_s16, %s6055_s16   ;;  %s4288_s15 = sphi %s4351_s15, %s6054_s15  }
   0x6   : > { %p27_p0 = scmp.ge.s32.totalorder %s26_s24, 6  ;;  %s29_s25 = sadd.s32 1, %s4312_s21 }
   0x7   : > { %s38_s26 = sadd.s32 1, %s4296_s17  ;;  %p45_p1 = scmp.ne.s32.totalorder %s4296_s17, %s4292_s16 }
   0x8   : > { %s6062_s24 = smov (%p27_p0, %s26_s24), 0  ;;  %s6064_s25 = smov (!%p27_p0, %s29_s25), %s4312_s21 }
   0x9   : > { %s34_s27 = ssub.s32 %s4308_s20, %s6062_s24  ;;  %p46_p2 = scmp.eq.s32.totalorder %s4316_s22, 0 }
   0xa   : > { %p31_p3 = scmp.ge.s32.totalorder %s6064_s25, 2  ;;  %p51_p4 = scmp.ne.s32.totalorder %s4292_s16, %s4288_s15 }
   0xb   : > { %p47_p5 = por %p46_p2, %p45_p1  ;;  %p52_p6 = scmp.eq.s32.totalorder %s3424_s23, 0 }
   0xc   : > { %s6066_s25 = smov (%p31_p3, %s6064_s25), 0  ;;  %p4042_p8 = scmp.lt.s32.totalorder %s4316_s22, 12 }
   0xd   : > { %p4404_p7 = por %p52_p6, %p51_p4  ;;  %s33_s29 = ssub.s32 %s4312_s21, %s6066_s25 }
   0xe   : > { %s35_s30 = sor.u32 %s34_s27, %s33_s29  ;;  %s175_s5 = sand.u32 1, %s4296_s17  }
   0xf   : > { %p36_p9 = scmp.eq.s32.totalorder %s35_s30, 0  ;;  %s4032_s6 = smul.u32 3072, %s175_s5 }
  0x10   : > { %p4412_p10 = pnand %p4042_p8, %p47_p5  ;;  %s3683_s9 = smul.u32 768, %s4308_s20 }
  0x11   : > { %s4417_s8 = scalar_select %p36_p9, %s4296_s17, %s38_s26  }
  0x12   : > { %s4033_s10 = smul.u32 4608, %s4312_s21  ;;  %s179_s11 = scalar_lea.vmem [#allocation3], %s4032_s6 }
  0x13   : > { %s189_s12 = sshll.u32 %s179_s11, 4  ;;  %s4429_s26 = scalar_lea.sflag [#allocation4], %s175_s5  ;;  %s4421_s12 = int_to_ptr.vmem [resolvable:$true] %s189_s12 }
  0x14   : > { %s186_s13 = sadd.s32 %s4033_s10, %s3683_s9  ;;  %p4218_p13 = pneg %p4412_p10 }
  0x15   : > { %s3429_s14 = sshll.u32 %s186_s13, 6  ;;  %s4221_s9 = scalar_lea.hbm %s5867_s0, 589824 }
  0x16   : > { %s4426_s27 = scalar_lea.hbm %s5867_s0, %s3429_s14 }
  0x17   : > { %s4216_s29 = scalar_lea.hbm %s4426_s27, 49152  ;;  %p4222_p2 = scmp.lt.u32.totalorder %s4426_s27, %s5867_s0 }
  0x18   : > { %p4217_p12 = scmp.ne.s32.totalorder %s4426_s27, %s4216_s29  ;;  %p4223_p3 = scmp.lt.u32.totalorder %s4221_s9, %s4216_s29 }
  0x19   : > { %p4225_p5 = scmp.lt.u32.totalorder %s4216_s29, %s4426_s27 }
  0x1a   : > { %p4219_p0 = pnand %p4218_p13, %p4217_p12  ;;  %p4224_p4 = por %p4223_p3, %p4222_p2 }
  0x1c   : > { %p4220_p1 = pneg %p4219_p0  ;;  %p4226_p6 = por %p4225_p5, %p4224_p4 }
  0x1e   : > { %p4227_p8 = pnand %p4226_p6, %p4220_p1 }
  0x20   : > { %4230 = shalt.err (!%p4227_p8)
}
  0x21   : > { %s4231_s5 = scalar_lea.vmem %s4421_s12, 49152  ;;  %s4322_s13 = smov [#allocation3]  }
  0x22   : > { %p4232_p9 = scmp.ne.s32.totalorder %s4421_s12, %s4231_s5  ;;  %s4236_s14 = sshll.u32 %s4322_s13, 4  ;;  %s4237_s14 = int_to_ptr.vmem [resolvable:$false] %s4236_s14 }
  0x23   : > { %s4238_s15 = scalar_lea.vmem %s4237_s14, 98304  ;;  %p4239_p11 = scmp.lt.s32.totalorder %s4421_s12, %s4237_s14 }
  0x24   : > { %p4234_p12 = pnand %p4232_p9, %p4218_p13  ;;  %p4240_p2 = scmp.lt.s32.totalorder %s4238_s15, %s4231_s5 }
  0x26   : > { %p4235_p0 = pneg %p4234_p12  ;;  %p4241_p3 = por %p4240_p2, %p4239_p11 }
  0x28   : > { %p4242_p4 = pnand %p4241_p3, %p4235_p0 }
  0x2a   : > { %4245 = shalt.err (!%p4242_p4)
}
  0x2b   : > { %s4323_s23 = smov 64   ;;  %s4324_s29 = smov 4  }
  0x2c   : > { %4041 = dma.hbm_to_vmem [thread:$0]  (!%p4412_p10), %s4426_s27, 49152, %s4421_s12, %s4429_s26, %s4323_s23, %s4323_s23, %s4324_s29  }
  0x2d   : > { %p197_p13 = scmp.lt.s32.totalorder %s4316_s22, 13  ;;  %p5902_p1 = scmp.ge.s32.totalorder %s4316_s22, 1 }
  0x2f   : > { %p198_p5 = pnand %p5902_p1, %p197_p13 }
  0x30   : > { %s203_s30 = sand.u32 (!%p198_p5), 1, %s4292_s16  }
  0x31   : > { %201 = sbr.rel (%p198_p5) target bundleno = 538 (0x21a), region = 36  ;;  %s204_s9 = scalar_lea.sflag (!%p198_p5), [#allocation4], %s203_s30 }
  0x32   : > { %s4461_s6 = smul.u32 (!%p198_p5), 3072, %s203_s30 }
  0x34   : > { %s207_s10 = scalar_lea.vmem (!%p198_p5), [#allocation3], %s4461_s6 }
  0x38   : > { %4283 = dma.done.wait (%p4404_p7), %s204_s9, 49152  }
  0x39   : > { %4285 = vsyncadd (%p4404_p7), %s204_s9, 4294918144  ;;  %s238_s7 = smul.u32 12, %s4300_s18  ;;  %p239_p10 = scmp.lt.s32.totalorder %s4304_s19, 1  ;;  %v4474_v0 = vld [vmem:[%s5869_s2] ss:$0 sm:$0xff] }
  0x3a   : > { %v4479_v1 = vld [vmem:[%s5870_s3] ss:$0 sm:$0xff] }
  0x3b   : > { %s6068_s19 = smov (!%p239_p10, %s4304_s19), 1  ;;  %p241_p11 = scmp.lt.s32.totalorder %s238_s7, 71 }
  0x3c   : > { %s4035_s12 = smul.u32 1152, %s6068_s19  ;;  %s4486_s19 = smov 0  }
  0x3d   : > { %s6070_s7 = smov (!%p241_p11, %s238_s7), 71 }
  0x3e   : > { %s3431_s28 = sshll.u32 %s6070_s7, 4 }
  0x3f   : > { %s245_s13 = sadd.s32 %s4035_s12, %s3431_s28 }
  0x40   : > { %s3432_s14 = sshll.u32 %s245_s13, 2 }
  0x41   : > { %s4484_s23 = scalar_lea.vmem %s5871_s4, %s3432_s14 }
  0x42 LB: >> { %v4118_v2 = vld [vmem:[%s5868_s1] sm:$0xff]   ;;  %vm1238_vm0 = vcmask 1044480   ;;  %v4119_v3 = vld [vmem:[%s5868_s1 + $0x8] sm:$0x3f]   ;;  %vm1239_vm1 = vcmask 1045504   ;;  %s3684_s12 = smul.u32 768, %s4320_s19  ;;  %s4320_s19 = sphi %s4486_s19, %s257_s19  }
  0x43   : >> { %3832 = vmatprep.subr.bf16.mxu0 %v4118_v2  ;;  %4028 = vmatprep.subr.bf16.mxu1 %v4118_v2  ;;  %v4325_v4 = vmov 65535   ;;  %vm949_vm2 = vcmask 220160   ;;  %vm2666_vm3 = vcmask 523264   ;;  %vm3262_vm4 = vcmask 519168   ;;  %s3733_s26 = smul.u32 192, %s4320_s19  ;;  %s257_s19 = sadd.s32 1, %s4320_s19  }
  0x44   : >> { %3833 = vmatpush3.bf16.msra.mxu0 %v4118_v2  ;;  %4030 = vmatpush3.bf16.msra.mxu1 %v4118_v2  ;;  %v1240_v5 = vsel %vm1238_vm0, 4294967295, %v4325_v4  ;;  %s4500_s27 = scalar_lea.vmem %s207_s10, %s3684_s12 [#allocation3]  ;;  %p254_p7 = scmp.ge.s32.totalorder %s257_s19, 4  }
  0x45   : >> { %v1241_v6 = vsel %vm1239_vm1, %v1240_v5, 0  ;;  %v4120_v8 = vld [vmem:[%s4500_s27] sm:$0xff]   ;;  %v4122_v10 = vld [vmem:[%s4500_s27 + $0x8] sm:$0xff]   ;;  %v4124_v12 = vld [vmem:[%s4500_s27 + $0x10] sm:$0xff]   ;;  %s5109_s11 = scalar_lea.vmem %s4484_s23, %s3733_s26 }
  0x46   : >> { %v1243_v7 = vand.u32 %v4119_v3, %v1241_v6  ;;  %v4121_v9 = vld [vmem:[%s4500_s27 + $0x180] sm:$0xff]   ;;  %v4123_v11 = vld [vmem:[%s4500_s27 + $0x188] sm:$0xff]   ;;  %3836 = vmatprep.mubr.msk.bf16.mxu0 %vm949_vm2, %v4120_v8  ;;  %v4125_v13 = vld [vmem:[%s4500_s27 + $0x190] sm:$0xff]  }
  0x47   : >> { %3932 = vmatprep.mubr.msk.bf16.mxu1 %vm949_vm2, %v4121_v9  ;;  %v4126_v14 = vld [vmem:[%s4500_s27 + $0x18] sm:$0xff]   ;;  %v4128_v16 = vld [vmem:[%s4500_s27 + $0x20] sm:$0xff]   ;;  %v4130_v18 = vld [vmem:[%s4500_s27 + $0x28] sm:$0xff]  }
  0x48   : >> { %3834 = vmatprep.subr.bf16.mxu0 %v1243_v7  ;;  %4029 = vmatprep.subr.bf16.mxu1 %v1243_v7  ;;  %v4127_v15 = vld [vmem:[%s4500_s27 + $0x198] sm:$0xff]   ;;  %v4129_v17 = vld [vmem:[%s4500_s27 + $0x1a0] sm:$0xff]   ;;  %v4131_v19 = vld [vmem:[%s4500_s27 + $0x1a8] sm:$0xff]  }
  0x49   : >> { %3835 = vmatpush3.bf16.msra.mxu0 %v1243_v7  ;;  %4031 = vmatpush3.bf16.msra.mxu1 %v1243_v7  ;;  %v4132_v20 = vld [vmem:[%s4500_s27 + $0x30] sm:$0xff]   ;;  %v4134_v22 = vld [vmem:[%s4500_s27 + $0x38] sm:$0xff]   ;;  %v4136_v24 = vld [vmem:[%s4500_s27 + $0x40] sm:$0xff]  }
  0x4a   : >> { %v4133_v21 = vld [vmem:[%s4500_s27 + $0x1b0] sm:$0xff]   ;;  %v4135_v23 = vld [vmem:[%s4500_s27 + $0x1b8] sm:$0xff]   ;;  %v4137_v25 = vld [vmem:[%s4500_s27 + $0x1c0] sm:$0xff]  }
  0x4b   : >> { %v4138_v26 = vld [vmem:[%s4500_s27 + $0x48] sm:$0xff]   ;;  %v4140_v28 = vld [vmem:[%s4500_s27 + $0x50] sm:$0xff]   ;;  %v4142_v30 = vld [vmem:[%s4500_s27 + $0x58] sm:$0xff]  }
  0x4c   : >> { %3837 = vmatmul.mubr.msk.bf16.vlgmr.msra.gmra.mrb[0].mxu0 %vm949_vm2, %v4122_v10  ;;  %3933 = vmatmul.mubr.msk.bf16.vlgmr.msra.gmra.mrb[0].mxu1 %vm949_vm2, %v4123_v11  ;;  %v4139_v27 = vld [vmem:[%s4500_s27 + $0x1c8] sm:$0xff]   ;;  %v4141_v29 = vld [vmem:[%s4500_s27 + $0x1d0] sm:$0xff]   ;;  %v4143_v31 = vld [vmem:[%s4500_s27 + $0x1d8] sm:$0xff]  }
  0x4d   : >> { %3840 = vmatprep.mubr.msk.bf16.mxu0 %vm949_vm2, %v4124_v12  ;;  %3936 = vmatprep.mubr.msk.bf16.mxu1 %vm949_vm2, %v4125_v13  ;;  %v4144_v32 = vld [vmem:[%s4500_s27 + $0x60] sm:$0xff]   ;;  %v4146_v34 = vld [vmem:[%s4500_s27 + $0x68] sm:$0xff]   ;;  %v4148_v36 = vld [vmem:[%s4500_s27 + $0x70] sm:$0xff]  }
  0x4e   : >> { %v4145_v33 = vld [vmem:[%s4500_s27 + $0x1e0] sm:$0xff]   ;;  %v4147_v35 = vld [vmem:[%s4500_s27 + $0x1e8] sm:$0xff]   ;;  %v4149_v37 = vld [vmem:[%s4500_s27 + $0x1f0] sm:$0xff]  }
  0x4f   : >> { %v4150_v38 = vld [vmem:[%s4500_s27 + $0x78] sm:$0xff]   ;;  %v4152_v40 = vld [vmem:[%s4500_s27 + $0x80] sm:$0xff]   ;;  %v4154_v42 = vld [vmem:[%s4500_s27 + $0x88] sm:$0xff]  }
  0x50   : >> { %v4151_v39 = vld [vmem:[%s4500_s27 + $0x1f8] sm:$0xff]   ;;  %v4153_v41 = vld [vmem:[%s4500_s27 + $0x200] sm:$0xff]   ;;  %v4155_v43 = vld [vmem:[%s4500_s27 + $0x208] sm:$0xff]  }
  0x51   : >> { %v4156_v44 = vld [vmem:[%s4500_s27 + $0x90] sm:$0xff]   ;;  %v4158_v46 = vld [vmem:[%s4500_s27 + $0x98] sm:$0xff]   ;;  %v4160_v48 = vld [vmem:[%s4500_s27 + $0xa0] sm:$0xff]  }
  0x52   : >> { %v4157_v45 = vld [vmem:[%s4500_s27 + $0x210] sm:$0xff]   ;;  %v4159_v47 = vld [vmem:[%s4500_s27 + $0x218] sm:$0xff]   ;;  %v4161_v49 = vld [vmem:[%s4500_s27 + $0x220] sm:$0xff]  }
  0x53   : >> { %v4162_v50 = vld [vmem:[%s4500_s27 + $0xa8] sm:$0xff]   ;;  %v4164_v52 = vld [vmem:[%s4500_s27 + $0xb0] sm:$0xff]   ;;  %v4166_v54 = vld [vmem:[%s4500_s27 + $0xb8] sm:$0xff]  }
  0x54   : >> { %3841 = vmatmul.mubr.msk.bf16.gmra.mrb[4].mxu0 %vm949_vm2, %v4126_v14  ;;  %3937 = vmatmul.mubr.msk.bf16.gmra.mrb[4].mxu1 %vm949_vm2, %v4127_v15  ;;  %v4163_v51 = vld [vmem:[%s4500_s27 + $0x228] sm:$0xff]   ;;  %v4165_v53 = vld [vmem:[%s4500_s27 + $0x230] sm:$0xff]   ;;  %v4167_v55 = vld [vmem:[%s4500_s27 + $0x238] sm:$0xff]  }
  0x55   : >> { %3844 = vmatprep.mubr.msk.bf16.mxu0 %vm949_vm2, %v4128_v16  ;;  %3940 = vmatprep.mubr.msk.bf16.mxu1 %vm949_vm2, %v4129_v17  ;;  %v4168_v56 = vld [vmem:[%s4500_s27 + $0xc0] sm:$0xff]   ;;  %v4170_v58 = vld [vmem:[%s4500_s27 + $0xc8] sm:$0xff]   ;;  %v4172_v60 = vld [vmem:[%s4500_s27 + $0xd0] sm:$0xff]  }
  0x56   : >> { %v4169_v57 = vld [vmem:[%s4500_s27 + $0x240] sm:$0xff]   ;;  %v4171_v59 = vld [vmem:[%s4500_s27 + $0x248] sm:$0xff]   ;;  %v4173_v61 = vld [vmem:[%s4500_s27 + $0x250] sm:$0xff]  }
  0x57   : >> { %v4174_v62 = vld [vmem:[%s4500_s27 + $0xd8] sm:$0xff]   ;;  %v4176_v2 = vld [vmem:[%s4500_s27 + $0xe0] sm:$0xff]   ;;  %v4178_v4 = vld [vmem:[%s4500_s27 + $0xe8] sm:$0xff]  }
  0x58   : >> { %v4175_v63 = vld [vmem:[%s4500_s27 + $0x258] sm:$0xff]   ;;  %v4177_v3 = vld [vmem:[%s4500_s27 + $0x260] sm:$0xff]   ;;  %v4179_v5 = vld [vmem:[%s4500_s27 + $0x268] sm:$0xff]  }
  0x59   : >> { %v4180_v6 = vld [vmem:[%s4500_s27 + $0xf0] sm:$0xff]   ;;  %v4182_v8 = vld [vmem:[%s4500_s27 + $0xf8] sm:$0xff]   ;;  %v4184_v10 = vld [vmem:[%s4500_s27 + $0x100] sm:$0xff]  }
  0x5a   : >> { %v4181_v7 = vld [vmem:[%s4500_s27 + $0x270] sm:$0xff]   ;;  %v4183_v9 = vld [vmem:[%s4500_s27 + $0x278] sm:$0xff]   ;;  %v4185_v11 = vld [vmem:[%s4500_s27 + $0x280] sm:$0xff]  }
  0x5b   : >> { %v4186_v12 = vld [vmem:[%s4500_s27 + $0x108] sm:$0xff]   ;;  %v4188_v14 = vld [vmem:[%s4500_s27 + $0x110] sm:$0xff]   ;;  %v4190_v16 = vld [vmem:[%s4500_s27 + $0x118] sm:$0xff]  }
  0x5c   : >> { %3845 = vmatmul.mubr.msk.bf16.gmra.mrb[8].mxu0 %vm949_vm2, %v4130_v18  ;;  %3941 = vmatmul.mubr.msk.bf16.gmra.mrb[8].mxu1 %vm949_vm2, %v4131_v19  ;;  %v4187_v13 = vld [vmem:[%s4500_s27 + $0x288] sm:$0xff]   ;;  %v4189_v15 = vld [vmem:[%s4500_s27 + $0x290] sm:$0xff]   ;;  %v4191_v17 = vld [vmem:[%s4500_s27 + $0x298] sm:$0xff]  }
  0x5d   : >> { %3848 = vmatprep.mubr.msk.bf16.mxu0 %vm949_vm2, %v4132_v20  ;;  %3944 = vmatprep.mubr.msk.bf16.mxu1 %vm949_vm2, %v4133_v21  ;;  %v4192_v18 = vld [vmem:[%s4500_s27 + $0x120] sm:$0xff]   ;;  %v4194_v20 = vld [vmem:[%s4500_s27 + $0x128] sm:$0xff]  }
  0x5e   : >> { %v4193_v19 = vld [vmem:[%s4500_s27 + $0x2a0] sm:$0xff]   ;;  %v4195_v21 = vld [vmem:[%s4500_s27 + $0x2a8] sm:$0xff]  }
  0x64   : >> { %3849 = vmatmul.mubr.msk.bf16.gmra.mrb[12].mxu0 %vm949_vm2, %v4134_v22  ;;  %3945 = vmatmul.mubr.msk.bf16.gmra.mrb[12].mxu1 %vm949_vm2, %v4135_v23  ;;  %v4196_v22 = vld [vmem:[%s4500_s27 + $0x130] sm:$0xff]  }
  0x65   : >> { %3852 = vmatprep.mubr.msk.bf16.mxu0 %vm949_vm2, %v4136_v24  ;;  %3948 = vmatprep.mubr.msk.bf16.mxu1 %vm949_vm2, %v4137_v25  ;;  %v4197_v23 = vld [vmem:[%s4500_s27 + $0x2b0] sm:$0xff]   ;;  %v4198_v24 = vld [vmem:[%s4500_s27 + $0x138] sm:$0xff]  }
  0x66   : >> { %v4199_v25 = vld [vmem:[%s4500_s27 + $0x2b8] sm:$0xff]  }
  0x6c   : >> { %3853 = vmatmul.mubr.msk.bf16.gmra.mrb[16].mxu0 %vm949_vm2, %v4138_v26  ;;  %3949 = vmatmul.mubr.msk.bf16.gmra.mrb[16].mxu1 %vm949_vm2, %v4139_v27  ;;  %v4200_v26 = vld [vmem:[%s4500_s27 + $0x140] sm:$0xff]  }
  0x6d   : >> { %3856 = vmatprep.mubr.msk.bf16.mxu0 %vm949_vm2, %v4140_v28  ;;  %3952 = vmatprep.mubr.msk.bf16.mxu1 %vm949_vm2, %v4141_v29  ;;  %v4201_v27 = vld [vmem:[%s4500_s27 + $0x2c0] sm:$0xff]   ;;  %v4202_v28 = vld [vmem:[%s4500_s27 + $0x148] sm:$0xff]  }
  0x6e   : >> { %v4203_v29 = vld [vmem:[%s4500_s27 + $0x2c8] sm:$0xff]  }
  0x74   : >> { %3857 = vmatmul.mubr.msk.bf16.gmra.mrb[20].mxu0 %vm949_vm2, %v4142_v30  ;;  %3953 = vmatmul.mubr.msk.bf16.gmra.mrb[20].mxu1 %vm949_vm2, %v4143_v31  ;;  %v4204_v30 = vld [vmem:[%s4500_s27 + $0x150] sm:$0xff]  }
  0x75   : >> { %3860 = vmatprep.mubr.msk.bf16.mxu0 %vm949_vm2, %v4144_v32  ;;  %3956 = vmatprep.mubr.msk.bf16.mxu1 %vm949_vm2, %v4145_v33  ;;  %v4205_v31 = vld [vmem:[%s4500_s27 + $0x2d0] sm:$0xff]   ;;  %v4206_v32 = vld [vmem:[%s4500_s27 + $0x158] sm:$0xff]  }
  0x76   : >> { %v4207_v33 = vld [vmem:[%s4500_s27 + $0x2d8] sm:$0xff]  }
  0x7c   : >> { %3861 = vmatmul.mubr.msk.bf16.gmra.mrb[24].mxu0 %vm949_vm2, %v4146_v34  ;;  %3957 = vmatmul.mubr.msk.bf16.gmra.mrb[24].mxu1 %vm949_vm2, %v4147_v35  ;;  %v4208_v34 = vld [vmem:[%s4500_s27 + $0x160] sm:$0xff]  }
  0x7d   : >> { %3864 = vmatprep.mubr.msk.bf16.mxu0 %vm949_vm2, %v4148_v36  ;;  %3960 = vmatprep.mubr.msk.bf16.mxu1 %vm949_vm2, %v4149_v37  ;;  %v4209_v35 = vld [vmem:[%s4500_s27 + $0x2e0] sm:$0xff]   ;;  %v4210_v36 = vld [vmem:[%s4500_s27 + $0x168] sm:$0xff]  }
  0x7e   : >> { %v4211_v37 = vld [vmem:[%s4500_s27 + $0x2e8] sm:$0xff]  }
  0x84   : >> { %3865 = vmatmul.mubr.msk.bf16.gmra.mrb[28].mxu0 %vm949_vm2, %v4150_v38  ;;  %3961 = vmatmul.mubr.msk.bf16.gmra.mrb[28].mxu1 %vm949_vm2, %v4151_v39  ;;  %v4212_v38 = vld [vmem:[%s4500_s27 + $0x170] sm:$0xff]  }
  0x85   : >> { %3868 = vmatprep.mubr.msk.bf16.mxu0 %vm949_vm2, %v4152_v40  ;;  %3964 = vmatprep.mubr.msk.bf16.mxu1 %vm949_vm2, %v4153_v41  ;;  %v4213_v39 = vld [vmem:[%s4500_s27 + $0x2f0] sm:$0xff]   ;;  %v4214_v40 = vld [vmem:[%s4500_s27 + $0x178] sm:$0xff]  }
  0x86   : >> { %v4215_v41 = vld [vmem:[%s4500_s27 + $0x2f8] sm:$0xff]  }
  0x8c   : >> { %3869 = vmatmul.mubr.msk.bf16.gmra.mrb[32].mxu0 %vm949_vm2, %v4154_v42  ;;  %3965 = vmatmul.mubr.msk.bf16.gmra.mrb[32].mxu1 %vm949_vm2, %v4155_v43 }
  0x8d   : >> { %3872 = vmatprep.mubr.msk.bf16.mxu0 %vm949_vm2, %v4156_v44  ;;  %3968 = vmatprep.mubr.msk.bf16.mxu1 %vm949_vm2, %v4157_v45 }
  0x94   : >> { %3873 = vmatmul.mubr.msk.bf16.gmra.mrb[36].mxu0 %vm949_vm2, %v4158_v46  ;;  %3969 = vmatmul.mubr.msk.bf16.gmra.mrb[36].mxu1 %vm949_vm2, %v4159_v47 }
  0x95   : >> { %3876 = vmatprep.mubr.msk.bf16.mxu0 %vm949_vm2, %v4160_v48  ;;  %3972 = vmatprep.mubr.msk.bf16.mxu1 %vm949_vm2, %v4161_v49 }
  0x9c   : >> { %3877 = vmatmul.mubr.msk.bf16.gmra.mrb[40].mxu0 %vm949_vm2, %v4162_v50  ;;  %3973 = vmatmul.mubr.msk.bf16.gmra.mrb[40].mxu1 %vm949_vm2, %v4163_v51 }
  0x9d   : >> { %3880 = vmatprep.mubr.msk.bf16.mxu0 %vm949_vm2, %v4164_v52  ;;  %3976 = vmatprep.mubr.msk.bf16.mxu1 %vm949_vm2, %v4165_v53 }
  0xa4   : >> { %3881 = vmatmul.mubr.msk.bf16.gmra.mrb[44].mxu0 %vm949_vm2, %v4166_v54  ;;  %3977 = vmatmul.mubr.msk.bf16.gmra.mrb[44].mxu1 %vm949_vm2, %v4167_v55 }
  0xa5   : >> { %3884 = vmatprep.mubr.msk.bf16.mxu0 %vm949_vm2, %v4168_v56  ;;  %3980 = vmatprep.mubr.msk.bf16.mxu1 %vm949_vm2, %v4169_v57 }
  0xac   : >> { %3885 = vmatmul.mubr.msk.bf16.gmra.mrb[48].mxu0 %vm949_vm2, %v4170_v58  ;;  %3981 = vmatmul.mubr.msk.bf16.gmra.mrb[48].mxu1 %vm949_vm2, %v4171_v59 }
  0xad   : >> { %3888 = vmatprep.mubr.msk.bf16.mxu0 %vm949_vm2, %v4172_v60  ;;  %3984 = vmatprep.mubr.msk.bf16.mxu1 %vm949_vm2, %v4173_v61 }
  0xb4   : >> { %3889 = vmatmul.mubr.msk.bf16.gmra.mrb[52].mxu0 %vm949_vm2, %v4174_v62  ;;  %3985 = vmatmul.mubr.msk.bf16.gmra.mrb[52].mxu1 %vm949_vm2, %v4175_v63 }
  0xb5   : >> { %3892 = vmatprep.mubr.msk.bf16.mxu0 %vm949_vm2, %v4176_v2  ;;  %3988 = vmatprep.mubr.msk.bf16.mxu1 %vm949_vm2, %v4177_v3 }
  0xbc   : >> { %3893 = vmatmul.mubr.msk.bf16.gmra.mrb[56].mxu0 %vm949_vm2, %v4178_v4  ;;  %3989 = vmatmul.mubr.msk.bf16.gmra.mrb[56].mxu1 %vm949_vm2, %v4179_v5 }
  0xbd   : >> { %3896 = vmatprep.mubr.msk.bf16.mxu0 %vm949_vm2, %v4180_v6  ;;  %3992 = vmatprep.mubr.msk.bf16.mxu1 %vm949_vm2, %v4181_v7 }
  0xc4   : >> { %3897 = vmatmul.mubr.msk.bf16.gmra.mrb[60].mxu0 %vm949_vm2, %v4182_v8  ;;  %3993 = vmatmul.mubr.msk.bf16.gmra.mrb[60].mxu1 %vm949_vm2, %v4183_v9 }
  0xc5   : >> { %3900 = vmatprep.mubr.msk.bf16.mxu0 %vm949_vm2, %v4184_v10  ;;  %3996 = vmatprep.mubr.msk.bf16.mxu1 %vm949_vm2, %v4185_v11 }
  0xcc   : >> { %3901 = vmatmul.mubr.msk.bf16.gmra.mrb[64].mxu0 %vm949_vm2, %v4186_v12  ;;  %3997 = vmatmul.mubr.msk.bf16.gmra.mrb[64].mxu1 %vm949_vm2, %v4187_v13 }
  0xcd   : >> { %3904 = vmatprep.mubr.msk.bf16.mxu0 %vm949_vm2, %v4188_v14  ;;  %4000 = vmatprep.mubr.msk.bf16.mxu1 %vm949_vm2, %v4189_v15 }
  0xd4   : >> { %3905 = vmatmul.mubr.msk.bf16.gmra.mrb[68].mxu0 %vm949_vm2, %v4190_v16  ;;  %4001 = vmatmul.mubr.msk.bf16.gmra.mrb[68].mxu1 %vm949_vm2, %v4191_v17 }
  0xd5   : >> { %3908 = vmatprep.mubr.msk.bf16.mxu0 %vm949_vm2, %v4192_v18  ;;  %4004 = vmatprep.mubr.msk.bf16.mxu1 %vm949_vm2, %v4193_v19 }
  0xdc   : >> { %3909 = vmatmul.mubr.msk.bf16.gmra.mrb[72].mxu0 %vm949_vm2, %v4194_v20  ;;  %4005 = vmatmul.mubr.msk.bf16.gmra.mrb[72].mxu1 %vm949_vm2, %v4195_v21 }
  0xdd   : >> { %3912 = vmatprep.mubr.msk.bf16.mxu0 %vm949_vm2, %v4196_v22  ;;  %4008 = vmatprep.mubr.msk.bf16.mxu1 %vm949_vm2, %v4197_v23 }
  0xe4   : >> { %3913 = vmatmul.mubr.msk.bf16.gmra.mrb[76].mxu0 %vm949_vm2, %v4198_v24  ;;  %4009 = vmatmul.mubr.msk.bf16.gmra.mrb[76].mxu1 %vm949_vm2, %v4199_v25 }
  0xe5   : >> { %3916 = vmatprep.mubr.msk.bf16.mxu0 %vm949_vm2, %v4200_v26  ;;  %4012 = vmatprep.mubr.msk.bf16.mxu1 %vm949_vm2, %v4201_v27 }
  0xec   : >> { %3917 = vmatmul.mubr.msk.bf16.gmra.mrb[80].mxu0 %vm949_vm2, %v4202_v28  ;;  %4013 = vmatmul.mubr.msk.bf16.gmra.mrb[80].mxu1 %vm949_vm2, %v4203_v29 }
  0xed   : >> { %3920 = vmatprep.mubr.msk.bf16.mxu0 %vm949_vm2, %v4204_v30  ;;  %4016 = vmatprep.mubr.msk.bf16.mxu1 %vm949_vm2, %v4205_v31 }
  0xf4   : >> { %3921 = vmatmul.mubr.msk.bf16.gmra.mrb[84].mxu0 %vm949_vm2, %v4206_v32  ;;  %4017 = vmatmul.mubr.msk.bf16.gmra.mrb[84].mxu1 %vm949_vm2, %v4207_v33 }
  0xf5   : >> { %3924 = vmatprep.mubr.msk.bf16.mxu0 %vm949_vm2, %v4208_v34  ;;  %4020 = vmatprep.mubr.msk.bf16.mxu1 %vm949_vm2, %v4209_v35 }
  0xfc   : >> { %3925 = vmatmul.mubr.msk.bf16.gmra.mrb[88].mxu0 %vm949_vm2, %v4210_v36  ;;  %4021 = vmatmul.mubr.msk.bf16.gmra.mrb[88].mxu1 %vm949_vm2, %v4211_v37 }
  0xfd   : >> { %3928 = vmatprep.mubr.msk.bf16.mxu0 %vm949_vm2, %v4212_v38  ;;  %4024 = vmatprep.mubr.msk.bf16.mxu1 %vm949_vm2, %v4213_v39 }
 0x104   : >> { %3929 = vmatmul.mubr.msk.bf16.gmra.mrb[92].mxu0 %vm949_vm2, %v4214_v40  ;;  %4025 = vmatmul.mubr.msk.bf16.gmra.mrb[92].mxu1 %vm949_vm2, %v4215_v41 }
 0x11f   : >> { %v3838_v42 = vpop.f32.mrb[0].mxu0  ;;  %v3934_v43 = vpop.f32.mrb[0].mxu1 }
 0x120   : >> { %v1279_v44 = vpop.f32.mrb[1].mxu0  ;;  %v1663_v45 = vpop.f32.mrb[1].mxu1  ;;  %v2054_v62 = vmul.f32 %v3838_v42, %v4474_v0  ;;  %v2150_v63 = vmul.f32 %v3934_v43, %v4474_v0 }
 0x121   : >> { %v3839_v46 = vpop.f32.mrb[2].mxu0  ;;  %v3935_v47 = vpop.f32.mrb[2].mxu1  ;;  %v2052_v4 = vmul.f32 %v4474_v0, %v1279_v44  ;;  %v2148_v5 = vmul.f32 %v4474_v0, %v1663_v45 }
 0x122   : >> { %v1282_v48 = vpop.f32.mrb[3].mxu0  ;;  %v1666_v49 = vpop.f32.mrb[3].mxu1  ;;  %v2055_v8 = vmul.f32 %v3839_v46, %v4474_v0  ;;  %v2151_v9 = vmul.f32 %v3935_v47, %v4474_v0  ;;  %v4703_v12 = vadd.f32 %v4479_v1, %v2054_v62  ;;  %v4706_v13 = vadd.f32 %v4479_v1, %v2150_v63 }
 0x123   : >> { %v2053_v10 = vmul.f32 %v4474_v0, %v1282_v48  ;;  %v2149_v11 = vmul.f32 %v4474_v0, %v1666_v49  ;;  %v4710_v15 = vadd.f32 %v4479_v1, %v2052_v4  ;;  %v4713_v16 = vadd.f32 %v4479_v1, %v2148_v5 }
 0x124   : >> { %v4717_v18 = vadd.f32 %v4479_v1, %v2055_v8  ;;  %v4720_v19 = vadd.f32 %v4479_v1, %v2151_v9 }
 0x125   : >> { %v4724_v23 = vadd.f32 %v4479_v1, %v2053_v10  ;;  %v4727_v24 = vadd.f32 %v4479_v1, %v2149_v11 }
 0x127   : >> { %v3842_v50 = vpop.f32.mrb[4].mxu0  ;;  %v3938_v51 = vpop.f32.mrb[4].mxu1 }
 0x128   : >> { %v1295_v52 = vpop.f32.mrb[5].mxu0  ;;  %v1679_v53 = vpop.f32.mrb[5].mxu1  ;;  %v2058_v14 = vmul.f32 %v3842_v50, %v4474_v0  ;;  %v2154_v17 = vmul.f32 %v3938_v51, %v4474_v0 }
 0x129   : >> { %v3843_v54 = vpop.f32.mrb[6].mxu0  ;;  %v3939_v55 = vpop.f32.mrb[6].mxu1  ;;  %v2056_v20 = vmul.f32 %v4474_v0, %v1295_v52  ;;  %v2152_v25 = vmul.f32 %v4474_v0, %v1679_v53 }
 0x12a   : >> { %v1298_v56 = vpop.f32.mrb[7].mxu0  ;;  %v1682_v57 = vpop.f32.mrb[7].mxu1  ;;  %v4733_v30 = vadd.f32 %v4479_v1, %v2058_v14  ;;  %v4742_v35 = vadd.f32 %v4479_v1, %v2154_v17  ;;  %v2059_v36 = vmul.f32 %v3843_v54, %v4474_v0  ;;  %v2155_v42 = vmul.f32 %v3939_v55, %v4474_v0 }
 0x12b   : >> { %v4752_v41 = vadd.f32 %v4479_v1, %v2056_v20  ;;  %v4758_v45 = vadd.f32 %v4479_v1, %v2152_v25  ;;  %v2057_v46 = vmul.f32 %v4474_v0, %v1298_v56  ;;  %v2153_v48 = vmul.f32 %v4474_v0, %v1682_v57 }
 0x12c   : >> { %v4767_v52 = vadd.f32 %v4479_v1, %v2059_v36  ;;  %v4773_v56 = vadd.f32 %v4479_v1, %v2155_v42 }
 0x12d   : >> { %v4779_v4 = vadd.f32 %v4479_v1, %v2057_v46  ;;  %v4784_v9 = vadd.f32 %v4479_v1, %v2153_v48 }
 0x12f   : >> { %v3846_v58 = vpop.f32.mrb[8].mxu0  ;;  %v3942_v59 = vpop.f32.mrb[8].mxu1  ;;  %5903 = vst [vmem:[#allocation6_spill] sm:$0xff] %v4784_v9 }
 0x130   : >> { %v1311_v60 = vpop.f32.mrb[9].mxu0  ;;  %v1695_v61 = vpop.f32.mrb[9].mxu1  ;;  %v2062_v49 = vmul.f32 %v3846_v58, %v4474_v0  ;;  %v2158_v50 = vmul.f32 %v3942_v59, %v4474_v0 }
 0x131   : >> { %v3847_v2 = vpop.f32.mrb[10].mxu0  ;;  %v3943_v3 = vpop.f32.mrb[10].mxu1  ;;  %v2060_v53 = vmul.f32 %v4474_v0, %v1311_v60  ;;  %v2156_v54 = vmul.f32 %v4474_v0, %v1695_v61 }
 0x132   : >> { %v1314_v6 = vpop.f32.mrb[11].mxu0  ;;  %v1698_v7 = vpop.f32.mrb[11].mxu1  ;;  %v2063_v57 = vmul.f32 %v3847_v2, %v4474_v0  ;;  %v2159_v58 = vmul.f32 %v3943_v3, %v4474_v0  ;;  %v4787_v2 = vadd.f32 %v4479_v1, %v2062_v49  ;;  %v4790_v3 = vadd.f32 %v4479_v1, %v2158_v50 }
 0x133   : >> { %v2061_v60 = vmul.f32 %v4474_v0, %v1314_v6  ;;  %v2157_v61 = vmul.f32 %v4474_v0, %v1698_v7  ;;  %v4795_v6 = vadd.f32 %v4479_v1, %v2060_v53  ;;  %v4798_v7 = vadd.f32 %v4479_v1, %v2156_v54 }
 0x134   : >> { %5904 = vst [vmem:[#allocation7_spill] sm:$0xff] %v4790_v3  ;;  %v4803_v46 = vadd.f32 %v4479_v1, %v2063_v57 }
 0x135   : >> { %5905 = vst [vmem:[#allocation8_spill] sm:$0xff] %v4798_v7  ;;  %v4811_v50 = vadd.f32 %v4479_v1, %v2061_v60  ;;  %v4814_v53 = vadd.f32 %v4479_v1, %v2157_v61 }
 0x137   : >> { %v3850_v21 = vpop.f32.mrb[12].mxu0  ;;  %v3946_v22 = vpop.f32.mrb[12].mxu1  ;;  %5907 = vst [vmem:[#allocation10_spill] sm:$0xff] %v4814_v53 }
 0x138   : >> { %v1327_v26 = vpop.f32.mrb[13].mxu0  ;;  %v1711_v27 = vpop.f32.mrb[13].mxu1  ;;  %v2066_v10 = vmul.f32 %v3850_v21, %v4474_v0  ;;  %v2162_v20 = vmul.f32 %v3946_v22, %v4474_v0  ;;  %v4806_v21 = vadd.f32 %v4479_v1, %v2159_v58 }
 0x139   : >> { %v4735_v31 = vpop.f32.mrb[14].mxu0  ;;  %v4737_v32 = vpop.f32.mrb[14].mxu1  ;;  %v2064_v48 = vmul.f32 %v4474_v0, %v1327_v26  ;;  %v2160_v22 = vmul.f32 %v4474_v0, %v1711_v27 }
 0x13a   : >> { %v4745_v37 = vpop.f32.mrb[15].mxu0  ;;  %v4747_v38 = vpop.f32.mrb[15].mxu1  ;;  %5906 = vst [vmem:[#allocation9_spill] sm:$0xff] %v4806_v21  ;;  %v4821_v58 = vadd.f32 %v4479_v1, %v2066_v10  ;;  %v4826_v60 = vadd.f32 %v4479_v1, %v2162_v20  ;;  %v2067_v61 = vmul.f32 %v4735_v31, %v4474_v0  ;;  %v2163_v10 = vmul.f32 %v4737_v32, %v4474_v0 }
 0x13b   : >> { %v4833_v51 = vadd.f32 %v4479_v1, %v2064_v48  ;;  %v4840_v40 = vadd.f32 %v4479_v1, %v2160_v22  ;;  %v2065_v31 = vmul.f32 %v4474_v0, %v4745_v37  ;;  %v2161_v29 = vmul.f32 %v4474_v0, %v4747_v38 }
 0x13c   : >> { %5908 = vst [vmem:[#allocation11_spill] sm:$0xff] %v4826_v60  ;;  %v4851_v22 = vadd.f32 %v4479_v1, %v2067_v61  ;;  %v4857_v38 = vadd.f32 %v4479_v1, %v2163_v10 }
 0x13d   : >> { %5909 = vst [vmem:[#allocation12_spill] sm:$0xff] %v4840_v40  ;;  %v4863_v61 = vadd.f32 %v4479_v1, %v2065_v31  ;;  %v4868_v55 = vadd.f32 %v4479_v1, %v2161_v29 }
 0x13e   : >> { %5910 = vst [vmem:[#allocation13_spill] sm:$0xff] %v4857_v38 }
 0x13f   : >> { %v3854_v62 = vpop.f32.mrb[16].mxu0  ;;  %v3950_v59 = vpop.f32.mrb[16].mxu1  ;;  %5911 = vst [vmem:[#allocation14_spill] sm:$0xff] %v4868_v55 }
 0x140   : >> { %v1343_v5 = vpop.f32.mrb[17].mxu0  ;;  %v1727_v8 = vpop.f32.mrb[17].mxu1  ;;  %v2070_v32 = vmul.f32 %v3854_v62, %v4474_v0  ;;  %v2166_v27 = vmul.f32 %v3950_v59, %v4474_v0 }
 0x141   : >> { %v3855_v11 = vpop.f32.mrb[18].mxu0  ;;  %v3951_v14 = vpop.f32.mrb[18].mxu1  ;;  %v2068_v37 = vmul.f32 %v4474_v0, %v1343_v5  ;;  %v2164_v57 = vmul.f32 %v4474_v0, %v1727_v8 }
 0x142   : >> { %v1346_v25 = vpop.f32.mrb[19].mxu0  ;;  %v1730_v36 = vpop.f32.mrb[19].mxu1  ;;  %v2071_v62 = vmul.f32 %v3855_v11, %v4474_v0  ;;  %v2167_v59 = vmul.f32 %v3951_v14, %v4474_v0  ;;  %v4871_v17 = vadd.f32 %v4479_v1, %v2070_v32  ;;  %v4874_v10 = vadd.f32 %v4479_v1, %v2166_v27 }
 0x143   : >> { %v2069_v5 = vmul.f32 %v4474_v0, %v1346_v25  ;;  %v2165_v8 = vmul.f32 %v4474_v0, %v1730_v36  ;;  %v4879_v31 = vadd.f32 %v4479_v1, %v2068_v37  ;;  %v4882_v25 = vadd.f32 %v4479_v1, %v2164_v57 }
 0x144   : >> { %5912 = vst [vmem:[#allocation15_spill] sm:$0xff] %v4874_v10  ;;  %v4887_v32 = vadd.f32 %v4479_v1, %v2071_v62  ;;  %v4890_v27 = vadd.f32 %v4479_v1, %v2167_v59 }
 0x145   : >> { %5913 = vst [vmem:[#allocation16_spill] sm:$0xff] %v4882_v25  ;;  %v4895_v47 = vadd.f32 %v4479_v1, %v2069_v5  ;;  %v4898_v57 = vadd.f32 %v4479_v1, %v2165_v8 }
 0x146   : >> { %5914 = vst [vmem:[#allocation17_spill] sm:$0xff] %v4890_v27 }
 0x147   : >> { %v3858_v42 = vpop.f32.mrb[20].mxu0  ;;  %v3954_v44 = vpop.f32.mrb[20].mxu1  ;;  %5915 = vst [vmem:[#allocation18_spill] sm:$0xff] %v4898_v57 }
 0x148   : >> { %v1359_v34 = vpop.f32.mrb[21].mxu0  ;;  %v1743_v54 = vpop.f32.mrb[21].mxu1  ;;  %v2074_v11 = vmul.f32 %v3858_v42, %v4474_v0  ;;  %v2170_v36 = vmul.f32 %v3954_v44, %v4474_v0 }
 0x149   : >> { %v3859_v63 = vpop.f32.mrb[22].mxu0  ;;  %v3955_v26 = vpop.f32.mrb[22].mxu1  ;;  %v2072_v42 = vmul.f32 %v4474_v0, %v1359_v34  ;;  %v2168_v44 = vmul.f32 %v4474_v0, %v1743_v54 }
 0x14a   : >> { %v1362_v49 = vpop.f32.mrb[23].mxu0  ;;  %v1746_v48 = vpop.f32.mrb[23].mxu1  ;;  %v4905_v39 = vadd.f32 %v4479_v1, %v2074_v11  ;;  %v4910_v28 = vadd.f32 %v4479_v1, %v2170_v36  ;;  %v2075_v54 = vmul.f32 %v3859_v63, %v4474_v0  ;;  %v2171_v10 = vmul.f32 %v3955_v26, %v4474_v0 }
 0x14b   : >> { %v4916_v11 = vadd.f32 %v4479_v1, %v2072_v42  ;;  %v4922_v36 = vadd.f32 %v4479_v1, %v2168_v44  ;;  %v2073_v63 = vmul.f32 %v4474_v0, %v1362_v49  ;;  %v2169_v59 = vmul.f32 %v4474_v0, %v1746_v48 }
 0x14c   : >> { %5916 = vst [vmem:[#allocation19_spill] sm:$0xff] %v4910_v28  ;;  %v4931_v26 = vadd.f32 %v4479_v1, %v2075_v54  ;;  %v4937_v49 = vadd.f32 %v4479_v1, %v2171_v10 }
 0x14d   : >> { %5917 = vst [vmem:[#allocation20_spill] sm:$0xff] %v4922_v36  ;;  %v4943_v54 = vadd.f32 %v4479_v1, %v2073_v63  ;;  %v4948_v10 = vadd.f32 %v4479_v1, %v2169_v59 }
 0x14e   : >> { %5918 = vst [vmem:[#allocation21_spill] sm:$0xff] %v4937_v49 }
 0x14f   : >> { %v3862_v20 = vpop.f32.mrb[24].mxu0  ;;  %v3958_v14 = vpop.f32.mrb[24].mxu1  ;;  %5919 = vst [vmem:[#allocation22_spill] sm:$0xff] %v4948_v10 }
 0x150   : >> { %v1375_v29 = vpop.f32.mrb[25].mxu0  ;;  %v1759_v62 = vpop.f32.mrb[25].mxu1  ;;  %v2078_v34 = vmul.f32 %v3862_v20, %v4474_v0  ;;  %v2174_v42 = vmul.f32 %v3958_v14, %v4474_v0 }
 0x151   : >> { %v3863_v37 = vpop.f32.mrb[26].mxu0  ;;  %v3959_v33 = vpop.f32.mrb[26].mxu1  ;;  %v2076_v8 = vmul.f32 %v4474_v0, %v1375_v29  ;;  %v2172_v44 = vmul.f32 %v4474_v0, %v1759_v62 }
 0x152   : >> { %v1378_v38 = vpop.f32.mrb[27].mxu0  ;;  %v1762_v43 = vpop.f32.mrb[27].mxu1  ;;  %v2079_v48 = vmul.f32 %v3863_v37, %v4474_v0  ;;  %v2175_v20 = vmul.f32 %v3959_v33, %v4474_v0  ;;  %v4951_v37 = vadd.f32 %v4479_v1, %v2078_v34  ;;  %v4954_v33 = vadd.f32 %v4479_v1, %v2174_v42 }
 0x153   : >> { %v2077_v29 = vmul.f32 %v4474_v0, %v1378_v38  ;;  %v2173_v62 = vmul.f32 %v4474_v0, %v1762_v43  ;;  %v4959_v38 = vadd.f32 %v4479_v1, %v2076_v8  ;;  %v4962_v43 = vadd.f32 %v4479_v1, %v2172_v44 }
 0x154   : >> { %5920 = vst [vmem:[#allocation23_spill] sm:$0xff] %v4954_v33  ;;  %v4967_v42 = vadd.f32 %v4479_v1, %v2079_v48 }
 0x155   : >> { %5921 = vst [vmem:[#allocation24_spill] sm:$0xff] %v4962_v43  ;;  %v4975_v60 = vadd.f32 %v4479_v1, %v2077_v29  ;;  %v4978_v44 = vadd.f32 %v4479_v1, %v2173_v62 }
 0x157   : >> { %v3866_v25 = vpop.f32.mrb[28].mxu0  ;;  %v3962_v14 = vpop.f32.mrb[28].mxu1  ;;  %5923 = vst [vmem:[#allocation26_spill] sm:$0xff] %v4978_v44 }
 0x158   : >> { %v1391_v28 = vpop.f32.mrb[29].mxu0  ;;  %v1775_v5 = vpop.f32.mrb[29].mxu1  ;;  %v2082_v27 = vmul.f32 %v3866_v25, %v4474_v0  ;;  %v2178_v59 = vmul.f32 %v3962_v14, %v4474_v0  ;;  %v4970_v25 = vadd.f32 %v4479_v1, %v2175_v20 }
 0x159   : >> { %v3867_v36 = vpop.f32.mrb[30].mxu0  ;;  %v3963_v63 = vpop.f32.mrb[30].mxu1  ;;  %v2080_v57 = vmul.f32 %v4474_v0, %v1391_v28  ;;  %v2176_v14 = vmul.f32 %v4474_v0, %v1775_v5 }
 0x15a   : >> { %v1394_v55 = vpop.f32.mrb[31].mxu0  ;;  %v1778_v34 = vpop.f32.mrb[31].mxu1  ;;  %5922 = vst [vmem:[#allocation25_spill] sm:$0xff] %v4970_v25  ;;  %v4985_v20 = vadd.f32 %v4479_v1, %v2082_v27  ;;  %v4990_v8 = vadd.f32 %v4479_v1, %v2178_v59  ;;  %v2083_v62 = vmul.f32 %v3867_v36, %v4474_v0  ;;  %v2179_v27 = vmul.f32 %v3963_v63, %v4474_v0 }
 0x15b   : >> { %v4996_v48 = vadd.f32 %v4479_v1, %v2080_v57  ;;  %v5002_v59 = vadd.f32 %v4479_v1, %v2176_v14  ;;  %v2081_v57 = vmul.f32 %v4474_v0, %v1394_v55  ;;  %v2177_v25 = vmul.f32 %v4474_v0, %v1778_v34 }
 0x15c   : >> { %5924 = vst [vmem:[#allocation27_spill] sm:$0xff] %v4990_v8  ;;  %v5011_v29 = vadd.f32 %v4479_v1, %v2083_v62  ;;  %v5017_v55 = vadd.f32 %v4479_v1, %v2179_v27 }
 0x15d   : >> { %5925 = vst [vmem:[#allocation28_spill] sm:$0xff] %v5002_v59  ;;  %v5030_v3 = vadd.f32 %v4479_v1, %v2177_v25 }
 0x15e   : >> { %5926 = vst [vmem:[#allocation29_spill] sm:$0xff] %v5017_v55 }
 0x15f   : >> { %v3870_v49 = vpop.f32.mrb[32].mxu0  ;;  %v3966_v33 = vpop.f32.mrb[32].mxu1  ;;  %5927 = vst [vmem:[#allocation30_spill] sm:$0xff] %v5030_v3 }
 0x160   : >> { %v2086_v36 = vmul.f32 %v3870_v49, %v4474_v0  ;;  %v1407_v43 = vpop.f32.mrb[33].mxu0  ;;  %v1791_v5 = vpop.f32.mrb[33].mxu1  ;;  %v2182_v62 = vmul.f32 %v3966_v33, %v4474_v0 }
 0x161   : >> { %v2084_v63 = vmul.f32 %v4474_v0, %v1407_v43  ;;  %v3871_v10 = vpop.f32.mrb[34].mxu0  ;;  %v3967_v53 = vpop.f32.mrb[34].mxu1  ;;  %v2180_v40 = vmul.f32 %v4474_v0, %v1791_v5 }
 0x162   : >> { %v2284_v14 = vadd.f32 %v4479_v1, %v2086_v36  ;;  %v2087_v49 = vmul.f32 %v3871_v10, %v4474_v0  ;;  %v1410_v44 = vpop.f32.mrb[35].mxu0  ;;  %v1794_v21 = vpop.f32.mrb[35].mxu1  ;;  %v5025_v10 = vadd.f32 %v4479_v1, %v2081_v57  ;;  %v5041_v25 = vadd.f32 %v4479_v1, %v2182_v62 }
 0x163   : >> { %v2282_v43 = vadd.f32 %v4479_v1, %v2084_v63  ;;  %v2085_v34 = vmul.f32 %v4474_v0, %v1410_v44  ;;  %v5928_v44 = vmax.f32 %v4703_v12, 0.0  ;;  %v5930_v12 = vmax.f32 %v4717_v18, 0.0 }
 0x164   : >> { %v2476_v8 = vmax.f32 %v2284_v14, 0.0  ;;  %v2285_v36 = vadd.f32 %v4479_v1, %v2087_v49  ;;  %v2183_v14 = vmul.f32 %v3967_v53, %v4474_v0  ;;  %v5929_v49 = vmax.f32 %v4710_v15, 0.0 }
 0x165   : >> { %v2474_v7 = vmax.f32 %v2282_v43, 0.0  ;;  %v2283_v27 = vadd.f32 %v4479_v1, %v2085_v34  ;;  %v2181_v43 = vmul.f32 %v4474_v0, %v1794_v21  ;;  %v5050_v21 = vadd.f32 %v4479_v1, %v2180_v40 }
 0x166   : >> { %v2636_v63 = vmax.f32 %v5928_v44, %v2476_v8  ;;  %v2477_v28 = vmax.f32 %v2285_v36, 0.0 }
 0x167   : >> { %v2634_v57 = vmax.f32 %v5929_v49, %v2474_v7  ;;  %v2475_v59 = vmax.f32 %v2283_v27, 0.0  ;;  %v3874_v5 = vpop.f32.mrb[36].mxu0  ;;  %v3970_v9 = vpop.f32.mrb[36].mxu1  ;;  %v5931_v27 = vmax.f32 %v4724_v23, 0.0 }
 0x168   : >> { %2669 = vst.msk [vmem:[#allocation2 + $0x10] sm:$0xff] %vm2666_vm3, %v2636_v63  ;;  %v2637_v8 = vmax.f32 %v5930_v12, %v2477_v28  ;;  %v2090_v53 = vmul.f32 %v3874_v5, %v4474_v0  ;;  %v2186_v34 = vmul.f32 %v3970_v9, %v4474_v0  ;;  %v1423_v36 = vpop.f32.mrb[37].mxu0  ;;  %v1807_v15 = vpop.f32.mrb[37].mxu1  ;;  %v5058_v9 = vadd.f32 %v4479_v1, %v2183_v14 }
 0x169   : >> { %2667 = vst.msk [vmem:[#allocation2] sm:$0xff] %vm2666_vm3, %v2634_v57  ;;  %v2635_v62 = vmax.f32 %v5931_v27, %v2475_v59  ;;  %v2088_v44 = vmul.f32 %v4474_v0, %v1423_v36  ;;  %v3875_v18 = vpop.f32.mrb[38].mxu0  ;;  %v3971_v28 = vpop.f32.mrb[38].mxu1  ;;  %v5065_v59 = vadd.f32 %v4479_v1, %v2181_v43 }
 0x16a   : >> { %2670 = vst.msk [vmem:[#allocation2 + $0x18] sm:$0xff] %vm2666_vm3, %v2637_v8  ;;  %v2288_v49 = vadd.f32 %v4479_v1, %v2090_v53  ;;  %v2091_v57 = vmul.f32 %v3875_v18, %v4474_v0  ;;  %v1426_v40 = vpop.f32.mrb[39].mxu0  ;;  %v1810_v5 = vpop.f32.mrb[39].mxu1  ;;  %v5071_v36 = vadd.f32 %v4479_v1, %v2186_v34 }
 0x16b   : >> { %2668 = vst.msk [vmem:[#allocation2 + $0x8] sm:$0xff] %vm2666_vm3, %v2635_v62  ;;  %v2286_v12 = vadd.f32 %v4479_v1, %v2088_v44  ;;  %v2089_v14 = vmul.f32 %v4474_v0, %v1426_v40  ;;  %v2184_v62 = vmul.f32 %v4474_v0, %v1807_v15  ;;  %v5932_v44 = vmax.f32 %v4733_v30, 0.0 }
 0x16c   : >> { %v2480_v53 = vmax.f32 %v2288_v49, 0.0  ;;  %v2289_v27 = vadd.f32 %v4479_v1, %v2091_v57  ;;  %v2187_v49 = vmul.f32 %v3971_v28, %v4474_v0  ;;  %v5933_v57 = vmax.f32 %v4752_v41, 0.0 }
 0x16d   : >> { %v2478_v23 = vmax.f32 %v2286_v12, 0.0  ;;  %v2287_v43 = vadd.f32 %v4479_v1, %v2089_v14  ;;  %v2185_v12 = vmul.f32 %v4474_v0, %v1810_v5  ;;  %v5934_v30 = vmax.f32 %v4767_v52, 0.0 }
 0x16e   : >> { %v2640_v40 = vmax.f32 %v5932_v44, %v2480_v53  ;;  %v2481_v63 = vmax.f32 %v2289_v27, 0.0  ;;  %v5094_v5 = vadd.f32 %v4479_v1, %v2184_v62 }
 0x16f   : >> { %v2638_v8 = vmax.f32 %v5933_v57, %v2478_v23  ;;  %v2479_v18 = vmax.f32 %v2287_v43, 0.0  ;;  %v3878_v15 = vpop.f32.mrb[40].mxu0  ;;  %v3974_v33 = vpop.f32.mrb[40].mxu1  ;;  %v5935_v43 = vmax.f32 %v4779_v4, 0.0 }
 0x170   : >> { %2673 = vst.msk [vmem:[#allocation2 + $0x30] sm:$0xff] %vm2666_vm3, %v2640_v40  ;;  %v2641_v53 = vmax.f32 %v5934_v30, %v2481_v63  ;;  %v2094_v28 = vmul.f32 %v3878_v15, %v4474_v0  ;;  %v2190_v27 = vmul.f32 %v3974_v33, %v4474_v0  ;;  %v1439_v44 = vpop.f32.mrb[41].mxu0  ;;  %v1823_v34 = vpop.f32.mrb[41].mxu1 }
 0x171   : >> { %v2829_v41 = vld [vmem:[#allocation2 + $0x10] ss:$2 sm:$0xff]  ;;  %v2925_v23 = vld [vmem:[#allocation2 + $0x11] ss:$2 sm:$0xff]  ;;  %2671 = vst.msk [vmem:[#allocation2 + $0x20] sm:$0xff] %vm2666_vm3, %v2638_v8  ;;  %v2639_v40 = vmax.f32 %v5935_v43, %v2479_v18  ;;  %v2092_v52 = vmul.f32 %v4474_v0, %v1439_v44  ;;  %v2188_v63 = vmul.f32 %v4474_v0, %v1823_v34  ;;  %v3879_v57 = vpop.f32.mrb[42].mxu0  ;;  %v5102_v8 = vadd.f32 %v4479_v1, %v2187_v49 }
 0x172   : >> { %v3975_v33 = vpop.f32.mrb[42].mxu1  ;;  %v3019_v15 = vmax.f32 %v2829_v41, %v2925_v23  ;;  %v2827_v30 = vld [vmem:[#allocation2] ss:$2 sm:$0xff]  ;;  %v2923_v14 = vld [vmem:[#allocation2 + $0x1] ss:$2 sm:$0xff]  ;;  %2674 = vst.msk [vmem:[#allocation2 + $0x38] sm:$0xff] %vm2666_vm3, %v2641_v53  ;;  %v2292_v62 = vadd.f32 %v4479_v1, %v2094_v28  ;;  %v2095_v7 = vmul.f32 %v3879_v57, %v4474_v0  ;;  %v5113_v44 = vadd.f32 %v4479_v1, %v2185_v12 }
 0x173   : >> { %v1442_v4 = vpop.f32.mrb[43].mxu0  ;;  %v1826_v18 = vpop.f32.mrb[43].mxu1  ;;  %v3018_v34 = vmax.f32 %v2827_v30, %v2923_v14  ;;  %2672 = vst.msk [vmem:[#allocation2 + $0x28] sm:$0xff] %vm2666_vm3, %v2639_v40  ;;  %v5116_v49 = vadd.f32 %v4479_v1, %v2190_v27  ;;  %v2290_v53 = vadd.f32 %v4479_v1, %v2092_v52  ;;  %v2191_v43 = vmul.f32 %v3975_v33, %v4474_v0 }
 0x174   : >> { %v3686_v28 = vpack.c.bf16 %v3019_v15, %v3019_v15  ;;  %v2484_v41 = vmax.f32 %v2292_v62, 0.0  ;;  %v2293_v23 = vadd.f32 %v4479_v1, %v2095_v7  ;;  %v5123_v40 = vadd.f32 %v4479_v1, %v2188_v63 }
 0x175   : >> { %v3685_v57 = vpack.c.bf16 %v3018_v34, %v3018_v34  ;;  %v2482_v30 = vmax.f32 %v2290_v53, 0.0  ;;  %v5936_v12 = vmax.f32 %v4787_v2, 0.0  ;;  %v2093_v52 = vmul.f32 %v4474_v0, %v1442_v4 }
 0x176   : >> { %3264 = vst.msk [vmem:[%s5109_s11 + $0x4] sm:$0xf] %vm3262_vm4, %v3686_v28  ;;  %v2485_v3 = vmax.f32 %v2293_v23, 0.0  ;;  %v2189_v15 = vmul.f32 %v4474_v0, %v1826_v18  ;;  %v5937_v63 = vmax.f32 %v4795_v6, 0.0  ;;  %v5938_v2 = vmax.f32 %v4803_v46, 0.0 }
 0x177   : >> { %v2644_v27 = vmax.f32 %v5936_v12, %v2484_v41  ;;  %3263 = vst.msk [vmem:[%s5109_s11] sm:$0xf] %vm3262_vm4, %v3685_v57  ;;  %v3882_v53 = vpop.f32.mrb[44].mxu0  ;;  %v3978_v28 = vpop.f32.mrb[44].mxu1  ;;  %v5142_v18 = vadd.f32 %v4479_v1, %v2191_v43  ;;  %v2291_v41 = vadd.f32 %v4479_v1, %v2093_v52 }
 0x178   : >> { %v2642_v34 = vmax.f32 %v5937_v63, %v2482_v30  ;;  %v2645_v4 = vmax.f32 %v5938_v2, %v2485_v3  ;;  %v2098_v23 = vmul.f32 %v3882_v53, %v4474_v0  ;;  %v1455_v57 = vpop.f32.mrb[45].mxu0  ;;  %v1839_v12 = vpop.f32.mrb[45].mxu1  ;;  %v5148_v6 = vadd.f32 %v4479_v1, %v2189_v15 }
 0x179   : >> { %2677 = vst.msk [vmem:[#allocation2 + $0x50] sm:$0xff] %vm2666_vm3, %v2644_v27  ;;  %v2833_v62 = vld [vmem:[#allocation2 + $0x30] ss:$2 sm:$0xff]  ;;  %v2929_v33 = vld [vmem:[#allocation2 + $0x31] ss:$2 sm:$0xff]  ;;  %v2194_v30 = vmul.f32 %v3978_v28, %v4474_v0  ;;  %v2096_v3 = vmul.f32 %v4474_v0, %v1455_v57  ;;  %v2192_v46 = vmul.f32 %v4474_v0, %v1839_v12  ;;  %v3883_v43 = vpop.f32.mrb[46].mxu0 }
 0x17a   : >> { %2675 = vst.msk [vmem:[#allocation2 + $0x40] sm:$0xff] %vm2666_vm3, %v2642_v34  ;;  %v3979_v27 = vpop.f32.mrb[46].mxu1  ;;  %v3021_v52 = vmax.f32 %v2833_v62, %v2929_v33  ;;  %v2831_v63 = vld [vmem:[#allocation2 + $0x20] ss:$2 sm:$0xff]  ;;  %v2927_v53 = vld [vmem:[#allocation2 + $0x21] ss:$2 sm:$0xff]  ;;  %v2296_v15 = vadd.f32 %v4479_v1, %v2098_v23  ;;  %v2099_v55 = vmul.f32 %v3883_v43, %v4474_v0 }
 0x17b   : >> { %2678 = vst.msk [vmem:[#allocation2 + $0x58] sm:$0xff] %vm2666_vm3, %v2645_v4  ;;  %v2483_v7 = vmax.f32 %v2291_v41, 0.0  ;;  %v3020_v34 = vmax.f32 %v2831_v63, %v2927_v53  ;;  %v5157_v28 = vadd.f32 %v4479_v1, %v2194_v30  ;;  %v2294_v57 = vadd.f32 %v4479_v1, %v2096_v3  ;;  %v1458_v33 = vpop.f32.mrb[47].mxu0  ;;  %v1842_v62 = vpop.f32.mrb[47].mxu1 }
 0x17c   : >> { %v5161_v12 = vadd.f32 %v4479_v1, %v2192_v46  ;;  %v3688_v14 = vpack.c.bf16 %v3021_v52, %v3021_v52  ;;  %v5940_v2 = vmax.f32 %v4811_v50, 0.0  ;;  %v2488_v41 = vmax.f32 %v2296_v15, 0.0 }
 0x17d   : >> { %v3687_v23 = vpack.c.bf16 %v3020_v34, %v3020_v34  ;;  %v2486_v53 = vmax.f32 %v2294_v57, 0.0  ;;  %v5941_v3 = vmax.f32 %v4821_v58, 0.0  ;;  %v2297_v52 = vadd.f32 %v4479_v1, %v2099_v55 }
 0x17e   : >> { %5939 = vst [vmem:[#allocation31_spill] sm:$0xff] %v5161_v12  ;;  %v2643_v4 = vmax.f32 %v5940_v2, %v2483_v7  ;;  %3266 = vst.msk [vmem:[%s5109_s11 + $0xc] sm:$0xf] %vm3262_vm4, %v3688_v14  ;;  %v2195_v50 = vmul.f32 %v3979_v27, %v4474_v0  ;;  %v2097_v7 = vmul.f32 %v4474_v0, %v1458_v33  ;;  %v5942_v2 = vmax.f32 %v4833_v51, 0.0 }
 0x17f   : >> { %v2648_v46 = vmax.f32 %v5941_v3, %v2488_v41  ;;  %3265 = vst.msk [vmem:[%s5109_s11 + $0x8] sm:$0xf] %vm3262_vm4, %v3687_v23  ;;  %v2193_v34 = vmul.f32 %v4474_v0, %v1842_v62  ;;  %v3886_v57 = vpop.f32.mrb[48].mxu0  ;;  %v3982_v58 = vpop.f32.mrb[48].mxu1  ;;  %v2489_v55 = vmax.f32 %v2297_v52, 0.0 }
 0x180   : >> { %2676 = vst.msk [vmem:[#allocation2 + $0x48] sm:$0xff] %vm2666_vm3, %v2643_v4  ;;  %v2646_v15 = vmax.f32 %v5942_v2, %v2486_v53  ;;  %v5185_v27 = vadd.f32 %v4479_v1, %v2195_v50  ;;  %v2295_v33 = vadd.f32 %v4479_v1, %v2097_v7  ;;  %v2102_v4 = vmul.f32 %v3886_v57, %v4474_v0  ;;  %v1471_v41 = vpop.f32.mrb[49].mxu0  ;;  %v1855_v23 = vpop.f32.mrb[49].mxu1 }
 0x181   : >> { %2681 = vst.msk [vmem:[#allocation2 + $0x70] sm:$0xff] %vm2666_vm3, %v2648_v46  ;;  %v5191_v62 = vadd.f32 %v4479_v1, %v2193_v34  ;;  %v2198_v3 = vmul.f32 %v3982_v58, %v4474_v0  ;;  %v2100_v46 = vmul.f32 %v4474_v0, %v1471_v41  ;;  %v2196_v52 = vmul.f32 %v4474_v0, %v1855_v23  ;;  %v3887_v50 = vpop.f32.mrb[50].mxu0  ;;  %v3983_v2 = vpop.f32.mrb[50].mxu1 }
 0x182   : >> { %v2837_v51 = vld [vmem:[#allocation2 + $0x50] ss:$2 sm:$0xff]  ;;  %v2933_v53 = vld [vmem:[#allocation2 + $0x51] ss:$2 sm:$0xff]  ;;  %2679 = vst.msk [vmem:[#allocation2 + $0x60] sm:$0xff] %vm2666_vm3, %v2646_v15  ;;  %v5943_v57 = vmax.f32 %v4851_v22, 0.0  ;;  %v2300_v58 = vadd.f32 %v4479_v1, %v2102_v4 }
 0x183   : >> { %v3023_v7 = vmax.f32 %v2837_v51, %v2933_v53  ;;  %v2487_v30 = vmax.f32 %v2295_v33, 0.0  ;;  %v1474_v63 = vpop.f32.mrb[51].mxu0  ;;  %v1858_v15 = vpop.f32.mrb[51].mxu1  ;;  %v5202_v41 = vadd.f32 %v4479_v1, %v2198_v3  ;;  %v2298_v23 = vadd.f32 %v4479_v1, %v2100_v46 }
 0x184   : >> { %v2649_v14 = vmax.f32 %v5943_v57, %v2489_v55  ;;  %v5944_v22 = vmax.f32 %v4863_v61, 0.0  ;;  %v5209_v33 = vadd.f32 %v4479_v1, %v2196_v52  ;;  %v2103_v51 = vmul.f32 %v3887_v50, %v4474_v0 }
 0x185   : >> { %v3690_v12 = vpack.c.bf16 %v3023_v7, %v3023_v7  ;;  %v2492_v34 = vmax.f32 %v2300_v58, 0.0  ;;  %v2199_v3 = vmul.f32 %v3983_v2, %v4474_v0  ;;  %v2101_v46 = vmul.f32 %v4474_v0, %v1474_v63 }
 0x186   : >> { %2682 = vst.msk [vmem:[#allocation2 + $0x78] sm:$0xff] %vm2666_vm3, %v2649_v14  ;;  %v2647_v55 = vmax.f32 %v5944_v22, %v2487_v30  ;;  %v2490_v61 = vmax.f32 %v2298_v23, 0.0  ;;  %v2301_v52 = vadd.f32 %v4479_v1, %v2103_v51  ;;  %v5945_v50 = vmax.f32 %v4871_v17, 0.0 }
 0x187   : >> { %v2835_v53 = vld [vmem:[#allocation2 + $0x40] ss:$2 sm:$0xff]  ;;  %v2931_v57 = vld [vmem:[#allocation2 + $0x41] ss:$2 sm:$0xff]  ;;  %3268 = vst.msk [vmem:[%s5109_s11 + $0x14] sm:$0xf] %vm3262_vm4, %v3690_v12  ;;  %v5223_v58 = vadd.f32 %v4479_v1, %v2199_v3  ;;  %v2299_v2 = vadd.f32 %v4479_v1, %v2101_v46  ;;  %v2197_v63 = vmul.f32 %v4474_v0, %v1858_v15 }
 0x188   : >> { %v3022_v14 = vmax.f32 %v2835_v53, %v2931_v57  ;;  %2680 = vst.msk [vmem:[#allocation2 + $0x68] sm:$0xff] %vm2666_vm3, %v2647_v55  ;;  %v2652_v7 = vmax.f32 %v5945_v50, %v2492_v34  ;;  %v3890_v12 = vpop.f32.mrb[52].mxu0  ;;  %v3986_v22 = vpop.f32.mrb[52].mxu1  ;;  %v5946_v23 = vmax.f32 %v4879_v31, 0.0  ;;  %v2493_v57 = vmax.f32 %v2301_v52, 0.0 }
 0x189   : >> { %v2106_v51 = vmul.f32 %v3890_v12, %v4474_v0  ;;  %v1487_v30 = vpop.f32.mrb[53].mxu0  ;;  %v1871_v17 = vpop.f32.mrb[53].mxu1  ;;  %v2491_v3 = vmax.f32 %v2299_v2, 0.0  ;;  %v5233_v46 = vadd.f32 %v4479_v1, %v2197_v63  ;;  %v2202_v15 = vmul.f32 %v3986_v22, %v4474_v0 }
 0x18a   : >> { %v3689_v53 = vpack.c.bf16 %v3022_v14, %v3022_v14  ;;  %v2650_v55 = vmax.f32 %v5946_v23, %v2490_v61  ;;  %2685 = vst.msk [vmem:[#allocation2 + $0x90] sm:$0xff] %vm2666_vm3, %v2652_v7  ;;  %v3891_v50 = vpop.f32.mrb[54].mxu0  ;;  %v3987_v14 = vpop.f32.mrb[54].mxu1  ;;  %v5947_v31 = vmax.f32 %v4887_v32, 0.0  ;;  %v2104_v7 = vmul.f32 %v4474_v0, %v1487_v30 }
 0x18b   : >> { %v2304_v52 = vadd.f32 %v4479_v1, %v2106_v51  ;;  %v2200_v2 = vmul.f32 %v4474_v0, %v1871_v17  ;;  %v1490_v12 = vpop.f32.mrb[55].mxu0  ;;  %v1874_v63 = vpop.f32.mrb[55].mxu1  ;;  %v5948_v22 = vmax.f32 %v4895_v47, 0.0  ;;  %v2107_v32 = vmul.f32 %v3891_v50, %v4474_v0 }
 0x18c   : >> { %3267 = vst.msk [vmem:[%s5109_s11 + $0x10] sm:$0xf] %vm3262_vm4, %v3689_v53  ;;  %v2653_v61 = vmax.f32 %v5947_v31, %v2493_v57  ;;  %v2302_v51 = vadd.f32 %v4479_v1, %v2104_v7 }
 0x18d   : >> { %2683 = vst.msk [vmem:[#allocation2 + $0x80] sm:$0xff] %vm2666_vm3, %v2650_v55  ;;  %v2841_v23 = vld [vmem:[#allocation2 + $0x70] ss:$2 sm:$0xff]  ;;  %v2937_v34 = vld [vmem:[#allocation2 + $0x71] ss:$2 sm:$0xff]  ;;  %v2651_v4 = vmax.f32 %v5948_v22, %v2491_v3  ;;  %v5248_v55 = vadd.f32 %v4479_v1, %v2202_v15  ;;  %v2496_v30 = vmax.f32 %v2304_v52, 0.0  ;;  %v5254_v17 = vadd.f32 %v4479_v1, %v2200_v2 }
 0x18e   : >> { %v3025_v57 = vmax.f32 %v2841_v23, %v2937_v34  ;;  %2686 = vst.msk [vmem:[#allocation2 + $0x98] sm:$0xff] %vm2666_vm3, %v2653_v61  ;;  %v2305_v3 = vadd.f32 %v4479_v1, %v2107_v32  ;;  %v2203_v15 = vmul.f32 %v3987_v14, %v4474_v0  ;;  %v2105_v34 = vmul.f32 %v4474_v0, %v1490_v12 }
 0x18f   : >> { %v2839_v31 = vld [vmem:[#allocation2 + $0x60] ss:$2 sm:$0xff]  ;;  %v2935_v43 = vld [vmem:[#allocation2 + $0x61] ss:$2 sm:$0xff]  ;;  %2684 = vst.msk [vmem:[#allocation2 + $0x88] sm:$0xff] %vm2666_vm3, %v2651_v4  ;;  %v5949_v52 = vmax.f32 %v4905_v39, 0.0  ;;  %v2201_v12 = vmul.f32 %v4474_v0, %v1874_v63 }
 0x190   : >> { %v3692_v50 = vpack.c.bf16 %v3025_v57, %v3025_v57  ;;  %v3024_v61 = vmax.f32 %v2839_v31, %v2935_v43  ;;  %v2494_v2 = vmax.f32 %v2302_v51, 0.0  ;;  %v2497_v22 = vmax.f32 %v2305_v3, 0.0  ;;  %v3894_v47 = vpop.f32.mrb[56].mxu0  ;;  %v3990_v32 = vpop.f32.mrb[56].mxu1 }
 0x191   : >> { %v2656_v7 = vmax.f32 %v5949_v52, %v2496_v30  ;;  %v5265_v53 = vadd.f32 %v4479_v1, %v2203_v15  ;;  %v2303_v4 = vadd.f32 %v4479_v1, %v2105_v34  ;;  %v5950_v39 = vmax.f32 %v4916_v11, 0.0  ;;  %v1503_v30 = vpop.f32.mrb[57].mxu0  ;;  %v1887_v51 = vpop.f32.mrb[57].mxu1 }
 0x192   : >> { %3270 = vst.msk [vmem:[%s5109_s11 + $0x1c] sm:$0xf] %vm3262_vm4, %v3692_v50  ;;  %v3691_v14 = vpack.c.bf16 %v3024_v61, %v3024_v61  ;;  %v2110_v57 = vmul.f32 %v3894_v47, %v4474_v0  ;;  %v5951_v31 = vmax.f32 %v4931_v26, 0.0  ;;  %v2206_v50 = vmul.f32 %v3990_v32, %v4474_v0  ;;  %v3895_v61 = vpop.f32.mrb[58].mxu0  ;;  %v3991_v52 = vpop.f32.mrb[58].mxu1 }
 0x193   : >> { %2689 = vst.msk [vmem:[#allocation2 + $0xb0] sm:$0xff] %vm2666_vm3, %v2656_v7  ;;  %v2654_v43 = vmax.f32 %v5950_v39, %v2494_v2  ;;  %v2495_v34 = vmax.f32 %v2303_v4, 0.0  ;;  %v5283_v11 = vadd.f32 %v4479_v1, %v2201_v12  ;;  %v2108_v47 = vmul.f32 %v4474_v0, %v1503_v30  ;;  %v1506_v7 = vpop.f32.mrb[59].mxu0  ;;  %v1890_v2 = vpop.f32.mrb[59].mxu1 }
 0x194   : >> { %v2657_v3 = vmax.f32 %v5951_v31, %v2497_v22  ;;  %3269 = vst.msk [vmem:[%s5109_s11 + $0x18] sm:$0xf] %vm3262_vm4, %v3691_v14  ;;  %v2308_v63 = vadd.f32 %v4479_v1, %v2110_v57  ;;  %v2204_v26 = vmul.f32 %v4474_v0, %v1887_v51  ;;  %v5952_v32 = vmax.f32 %v4943_v54, 0.0 }
 0x195   : >> { %2687 = vst.msk [vmem:[#allocation2 + $0xa0] sm:$0xff] %vm2666_vm3, %v2654_v43  ;;  %v2845_v22 = vld [vmem:[#allocation2 + $0x90] ss:$2 sm:$0xff]  ;;  %v2941_v4 = vld [vmem:[#allocation2 + $0x91] ss:$2 sm:$0xff]  ;;  %v5292_v39 = vadd.f32 %v4479_v1, %v2206_v50  ;;  %v2111_v43 = vmul.f32 %v3895_v61, %v4474_v0  ;;  %v2207_v12 = vmul.f32 %v3991_v52, %v4474_v0  ;;  %v2306_v23 = vadd.f32 %v4479_v1, %v2108_v47 }
 0x196   : >> { %2690 = vst.msk [vmem:[#allocation2 + $0xb8] sm:$0xff] %vm2666_vm3, %v2657_v3  ;;  %v2655_v14 = vmax.f32 %v5952_v32, %v2495_v34  ;;  %v3027_v57 = vmax.f32 %v2845_v22, %v2941_v4  ;;  %v2843_v30 = vld [vmem:[#allocation2 + $0x80] ss:$2 sm:$0xff]  ;;  %v2939_v31 = vld [vmem:[#allocation2 + $0x81] ss:$2 sm:$0xff]  ;;  %v2500_v15 = vmax.f32 %v2308_v63, 0.0  ;;  %v5301_v34 = vadd.f32 %v4479_v1, %v2204_v26 }
 0x197   : >> { %v3026_v3 = vmax.f32 %v2843_v30, %v2939_v31  ;;  %v2309_v50 = vadd.f32 %v4479_v1, %v2111_v43  ;;  %v5954_v52 = vmax.f32 %v4951_v37, 0.0  ;;  %v2498_v4 = vmax.f32 %v2306_v23, 0.0  ;;  %v3898_v31 = vpop.f32.mrb[60].mxu0  ;;  %v3994_v26 = vpop.f32.mrb[60].mxu1 }
 0x198   : >> { %2688 = vst.msk [vmem:[#allocation2 + $0xa8] sm:$0xff] %vm2666_vm3, %v2655_v14  ;;  %5953 = vst [vmem:[#allocation32_spill] sm:$0xff] %v5301_v34  ;;  %v3694_v61 = vpack.c.bf16 %v3027_v57, %v3027_v57  ;;  %v5307_v63 = vadd.f32 %v4479_v1, %v2207_v12  ;;  %v2109_v30 = vmul.f32 %v4474_v0, %v1506_v7  ;;  %v5956_v37 = vmax.f32 %v4959_v38, 0.0  ;;  %v1519_v57 = vpop.f32.mrb[61].mxu0 }
 0x199   : >> { %v2660_v22 = vmax.f32 %v5954_v52, %v2500_v15  ;;  %v3693_v47 = vpack.c.bf16 %v3026_v3, %v3026_v3  ;;  %v2501_v14 = vmax.f32 %v2309_v50, 0.0  ;;  %v2205_v43 = vmul.f32 %v4474_v0, %v1890_v2  ;;  %v1903_v3 = vpop.f32.mrb[61].mxu1 }
 0x19a   : >> { %5955 = vst [vmem:[#allocation33_spill] sm:$0xff] %v5307_v63  ;;  %3272 = vst.msk [vmem:[%s5109_s11 + $0x24] sm:$0xf] %vm3262_vm4, %v3694_v61  ;;  %v2658_v15 = vmax.f32 %v5956_v37, %v2498_v4  ;;  %v2114_v12 = vmul.f32 %v3898_v31, %v4474_v0  ;;  %v5957_v7 = vmax.f32 %v4967_v42, 0.0  ;;  %v2307_v61 = vadd.f32 %v4479_v1, %v2109_v30  ;;  %v3995_v4 = vpop.f32.mrb[62].mxu1 }
 0x19b   : >> { %2693 = vst.msk [vmem:[#allocation2 + $0xd0] sm:$0xff] %vm2666_vm3, %v2660_v22  ;;  %v2210_v52 = vmul.f32 %v3994_v26, %v4474_v0  ;;  %v2112_v38 = vmul.f32 %v4474_v0, %v1519_v57  ;;  %v3899_v22 = vpop.f32.mrb[62].mxu0  ;;  %v5328_v2 = vadd.f32 %v4479_v1, %v2205_v43  ;;  %v2208_v42 = vmul.f32 %v4474_v0, %v1903_v3  ;;  %v1906_v31 = vpop.f32.mrb[63].mxu1 }
 0x19c   : >> { %3271 = vst.msk [vmem:[%s5109_s11 + $0x20] sm:$0xf] %vm3262_vm4, %v3693_v47  ;;  %v2661_v50 = vmax.f32 %v5957_v7, %v2501_v14  ;;  %v2312_v47 = vadd.f32 %v4479_v1, %v2114_v12  ;;  %v2115_v14 = vmul.f32 %v3899_v22, %v4474_v0  ;;  %v1522_v30 = vpop.f32.mrb[63].mxu0  ;;  %v2499_v57 = vmax.f32 %v2307_v61, 0.0 }
 0x19d   : >> { %v2849_v37 = vld [vmem:[#allocation2 + $0xb0] ss:$2 sm:$0xff]  ;;  %v2945_v23 = vld [vmem:[#allocation2 + $0xb1] ss:$2 sm:$0xff]  ;;  %2691 = vst.msk [vmem:[#allocation2 + $0xc0] sm:$0xff] %vm2666_vm3, %v2658_v15  ;;  %v5335_v7 = vadd.f32 %v4479_v1, %v2210_v52  ;;  %v2310_v15 = vadd.f32 %v4479_v1, %v2112_v38  ;;  %v5340_v3 = vadd.f32 %v4479_v1, %v2208_v42  ;;  %v5959_v51 = vmax.f32 %v4985_v20, 0.0 }
 0x19e   : >> { %v3029_v26 = vmax.f32 %v2849_v37, %v2945_v23  ;;  %2694 = vst.msk [vmem:[#allocation2 + $0xd8] sm:$0xff] %vm2666_vm3, %v2661_v50  ;;  %v2504_v54 = vmax.f32 %v2312_v47, 0.0  ;;  %v2313_v22 = vadd.f32 %v4479_v1, %v2115_v14  ;;  %v5958_v50 = vmax.f32 %v4975_v60, 0.0 }
 0x19f   : >> { %v2847_v43 = vld [vmem:[#allocation2 + $0xa0] ss:$2 sm:$0xff]  ;;  %v2943_v32 = vld [vmem:[#allocation2 + $0xa1] ss:$2 sm:$0xff]  ;;  %v2600_v52 = vmax.f32 %v5335_v7, 0.0  ;;  %v2502_v63 = vmax.f32 %v2310_v15, 0.0  ;;  %v2113_v60 = vmul.f32 %v4474_v0, %v1522_v30  ;;  %v2209_v42 = vmul.f32 %v4474_v0, %v1906_v31 }
 0x1a0   : >> { %v3696_v23 = vpack.c.bf16 %v3029_v26, %v3029_v26  ;;  %v3028_v37 = vmax.f32 %v2847_v43, %v2943_v32  ;;  %v2659_v61 = vmax.f32 %v5958_v50, %v2499_v57  ;;  %v2664_v38 = vmax.f32 %v5959_v51, %v2504_v54  ;;  %v3902_v14 = vpop.f32.mrb[64].mxu0  ;;  %v3998_v26 = vpop.f32.mrb[64].mxu1 }
 0x1a1   : >> { %v2505_v12 = vmax.f32 %v2313_v22, 0.0  ;;  %v2211_v32 = vmul.f32 %v3995_v4, %v4474_v0  ;;  %v5960_v20 = vmax.f32 %v4996_v48, 0.0  ;;  %v5961_v54 = vmax.f32 %v5011_v29, 0.0  ;;  %v1535_v22 = vpop.f32.mrb[65].mxu0  ;;  %v1919_v4 = vpop.f32.mrb[65].mxu1 }
 0x1a2   : >> { %3274 = vst.msk [vmem:[%s5109_s11 + $0x2c] sm:$0xf] %vm3262_vm4, %v3696_v23  ;;  %v3695_v47 = vpack.c.bf16 %v3028_v37, %v3028_v37  ;;  %v2118_v15 = vmul.f32 %v3902_v14, %v4474_v0  ;;  %v2214_v43 = vmul.f32 %v3998_v26, %v4474_v0  ;;  %v2311_v31 = vadd.f32 %v4479_v1, %v2113_v60  ;;  %v3903_v29 = vpop.f32.mrb[66].mxu0 }
 0x1a3   : >> { %2692 = vst.msk [vmem:[#allocation2 + $0xc8] sm:$0xff] %vm2666_vm3, %v2659_v61  ;;  %2697 = vst.msk [vmem:[#allocation2 + $0xf0] sm:$0xff] %vm2666_vm3, %v2664_v38  ;;  %v2662_v51 = vmax.f32 %v5960_v20, %v2502_v63  ;;  %v2665_v57 = vmax.f32 %v5961_v54, %v2505_v12  ;;  %v5365_v30 = vadd.f32 %v4479_v1, %v2211_v32  ;;  %v3999_v63 = vpop.f32.mrb[66].mxu1  ;;  %v1538_v32 = vpop.f32.mrb[67].mxu0 }
 0x1a4   : >> { %3273 = vst.msk [vmem:[%s5109_s11 + $0x28] sm:$0xf] %vm3262_vm4, %v3695_v47  ;;  %v5369_v23 = vadd.f32 %v4479_v1, %v2209_v42  ;;  %v2116_v48 = vmul.f32 %v4474_v0, %v1535_v22  ;;  %v2316_v50 = vadd.f32 %v4479_v1, %v2118_v15  ;;  %v2412_v61 = vadd.f32 %v4479_v1, %v2214_v43  ;;  %v1922_v60 = vpop.f32.mrb[67].mxu1 }
 0x1a5   : >> { %v2853_v12 = vld [vmem:[#allocation2 + $0xd0] ss:$2 sm:$0xff]  ;;  %v2949_v37 = vld [vmem:[#allocation2 + $0xd1] ss:$2 sm:$0xff]  ;;  %2695 = vst.msk [vmem:[#allocation2 + $0xe0] sm:$0xff] %vm2666_vm3, %v2662_v51  ;;  %2698 = vst.msk [vmem:[#allocation2 + $0xf8] sm:$0xff] %vm2666_vm3, %v2665_v57  ;;  %v2212_v38 = vmul.f32 %v4474_v0, %v1919_v4  ;;  %v2119_v47 = vmul.f32 %v3903_v29, %v4474_v0 }
 0x1a6   : >> { %v3031_v42 = vmax.f32 %v2853_v12, %v2949_v37  ;;  %v2503_v26 = vmax.f32 %v2311_v31, 0.0  ;;  %v2508_v51 = vmax.f32 %v2316_v50, 0.0  ;;  %v2604_v54 = vmax.f32 %v2412_v61, 0.0 }
 0x1a7   : >> { %v2314_v57 = vadd.f32 %v4479_v1, %v2116_v48  ;;  %v2410_v15 = vadd.f32 %v4479_v1, %v2212_v38  ;;  %v5962_v22 = vmax.f32 %v5025_v10, 0.0  ;;  %v2317_v29 = vadd.f32 %v4479_v1, %v2119_v47 }
 0x1a8   : >> { %v3698_v43 = vpack.c.bf16 %v3031_v42, %v3031_v42  ;;  %v2215_v12 = vmul.f32 %v3999_v63, %v4474_v0  ;;  %v5963_v31 = vmax.f32 %v4706_v13, 0.0  ;;  %v5964_v50 = vmax.f32 %v5041_v25, 0.0  ;;  %v3906_v42 = vpop.f32.mrb[68].mxu0 }
 0x1a9   : >> { %v2663_v4 = vmax.f32 %v5962_v22, %v2503_v26  ;;  %v2506_v20 = vmax.f32 %v2314_v57, 0.0  ;;  %v2602_v48 = vmax.f32 %v2410_v15, 0.0  ;;  %v2509_v10 = vmax.f32 %v2317_v29, 0.0  ;;  %v4002_v26 = vpop.f32.mrb[68].mxu1  ;;  %v1551_v15 = vpop.f32.mrb[69].mxu0 }
 0x1aa   : >> { %v2851_v37 = vld [vmem:[#allocation2 + $0xc0] ss:$2 sm:$0xff]  ;;  %v2947_v14 = vld [vmem:[#allocation2 + $0xc1] ss:$2 sm:$0xff]  ;;  %v2701_v34 = vmax.f32 %v2508_v51, %v5963_v31  ;;  %v2765_v61 = vmax.f32 %v5964_v50, %v2604_v54  ;;  %3276 = vst.msk [vmem:[%s5109_s11 + $0x34] sm:$0xf] %vm3262_vm4, %v3698_v43  ;;  %v2413_v47 = vadd.f32 %v4479_v1, %v2215_v12  ;;  %v2117_v63 = vmul.f32 %v4474_v0, %v1538_v32 }
 0x1ab   : >> { %v3030_v38 = vmax.f32 %v2851_v37, %v2947_v14  ;;  %2696 = vst.msk [vmem:[#allocation2 + $0xe8] sm:$0xff] %vm2666_vm3, %v2663_v4  ;;  %v5965_v13 = vmax.f32 %v4713_v16, 0.0  ;;  %v5966_v51 = vmax.f32 %v5050_v21, 0.0  ;;  %v2213_v14 = vmul.f32 %v4474_v0, %v1922_v60  ;;  %v1935_v43 = vpop.f32.mrb[69].mxu1 }
 0x1ac   : >> { %2733 = vst.msk [vmem:[#allocation2 + $0x110] sm:$0xff] %vm2666_vm3, %v2701_v34  ;;  %2797 = vst.msk [vmem:[#allocation2 + $0x210] sm:$0xff] %vm2666_vm3, %v2765_v61  ;;  %v2122_v57 = vmul.f32 %v3906_v42, %v4474_v0  ;;  %v2857_v22 = vld [vmem:[#allocation2 + $0xf0] ss:$2 sm:$0xff]  ;;  %v2953_v4 = vld [vmem:[#allocation2 + $0xf1] ss:$2 sm:$0xff]  ;;  %v2315_v16 = vadd.f32 %v4479_v1, %v2117_v63  ;;  %v2218_v31 = vmul.f32 %v4002_v26, %v4474_v0 }
 0x1ad   : >> { %v2699_v25 = vmax.f32 %v2506_v20, %v5965_v13  ;;  %v2763_v54 = vmax.f32 %v5966_v51, %v2602_v48  ;;  %v3697_v32 = vpack.c.bf16 %v3030_v38, %v3030_v38  ;;  %v5967_v34 = vmax.f32 %v4720_v19, 0.0  ;;  %v3907_v20 = vpop.f32.mrb[70].mxu0  ;;  %v4003_v50 = vpop.f32.mrb[70].mxu1 }
 0x1ae   : >> { %v2605_v12 = vmax.f32 %v2413_v47, 0.0  ;;  %v3033_v37 = vmax.f32 %v2857_v22, %v2953_v4  ;;  %v2411_v21 = vadd.f32 %v4479_v1, %v2213_v14  ;;  %v2320_v60 = vadd.f32 %v4479_v1, %v2122_v57  ;;  %v1554_v61 = vpop.f32.mrb[71].mxu0  ;;  %v1938_v63 = vpop.f32.mrb[71].mxu1 }
 0x1af   : >> { %v2702_v29 = vmax.f32 %v2509_v10, %v5967_v34  ;;  %2731 = vst.msk [vmem:[#allocation2 + $0x100] sm:$0xff] %vm2666_vm3, %v2699_v25  ;;  %2795 = vst.msk [vmem:[#allocation2 + $0x200] sm:$0xff] %vm2666_vm3, %v2763_v54  ;;  %v5968_v19 = vmax.f32 %v5058_v9, 0.0  ;;  %v2507_v38 = vmax.f32 %v2315_v16, 0.0  ;;  %v2120_v10 = vmul.f32 %v4474_v0, %v1551_v15 }
 0x1b0   : >> { %3275 = vst.msk [vmem:[%s5109_s11 + $0x30] sm:$0xf] %vm3262_vm4, %v3697_v32  ;;  %v2216_v47 = vmul.f32 %v4474_v0, %v1935_v43  ;;  %v3700_v42 = vpack.c.bf16 %v3033_v37, %v3033_v37  ;;  %v2603_v13 = vmax.f32 %v2411_v21, 0.0  ;;  %v2512_v25 = vmax.f32 %v2320_v60, 0.0  ;;  %v3910_v21 = vpop.f32.mrb[72].mxu0  ;;  %v4006_v60 = vpop.f32.mrb[72].mxu1 }
 0x1b1   : >> { %2734 = vst.msk [vmem:[#allocation2 + $0x118] sm:$0xff] %vm2666_vm3, %v2702_v29  ;;  %v2766_v48 = vmax.f32 %v5968_v19, %v2605_v12  ;;  %v2416_v26 = vadd.f32 %v4479_v1, %v2218_v31  ;;  %v5969_v51 = vmax.f32 %v4727_v24, 0.0  ;;  %v2318_v14 = vadd.f32 %v4479_v1, %v2120_v10 }
 0x1b2   : >> { %v2414_v9 = vadd.f32 %v4479_v1, %v2216_v47  ;;  %v2123_v57 = vmul.f32 %v3907_v20, %v4474_v0  ;;  %3278 = vst.msk [vmem:[%s5109_s11 + $0x3c] sm:$0xf] %vm3262_vm4, %v3700_v42  ;;  %v2855_v15 = vld [vmem:[#allocation2 + $0xe0] ss:$2 sm:$0xff]  ;;  %v2951_v43 = vld [vmem:[#allocation2 + $0xe1] ss:$2 sm:$0xff]  ;;  %v2219_v24 = vmul.f32 %v4003_v50, %v4474_v0  ;;  %v2121_v50 = vmul.f32 %v4474_v0, %v1554_v61 }
 0x1b3   : >> { %2798 = vst.msk [vmem:[#allocation2 + $0x218] sm:$0xff] %vm2666_vm3, %v2766_v48  ;;  %v2700_v54 = vmax.f32 %v2507_v38, %v5969_v51  ;;  %v5970_v32 = vmax.f32 %v5065_v59, 0.0  ;;  %v5971_v4 = vmax.f32 %v4742_v35, 0.0  ;;  %v2608_v29 = vmax.f32 %v2416_v26, 0.0  ;;  %v1567_v48 = vpop.f32.mrb[73].mxu0  ;;  %v1951_v38 = vpop.f32.mrb[73].mxu1 }
 0x1b4   : >> { %v3032_v12 = vmax.f32 %v2855_v15, %v2951_v43  ;;  %v2510_v16 = vmax.f32 %v2318_v14, 0.0  ;;  %v2606_v37 = vmax.f32 %v2414_v9, 0.0  ;;  %v2321_v20 = vadd.f32 %v4479_v1, %v2123_v57  ;;  %v3911_v51 = vpop.f32.mrb[74].mxu0 }
 0x1b5   : >> { %v2764_v22 = vmax.f32 %v5970_v32, %v2603_v13  ;;  %v2705_v34 = vmax.f32 %v2512_v25, %v5971_v4  ;;  %2732 = vst.msk [vmem:[#allocation2 + $0x108] sm:$0xff] %vm2666_vm3, %v2700_v54  ;;  %v5972_v59 = vmax.f32 %v5071_v36, 0.0  ;;  %v2417_v31 = vadd.f32 %v4479_v1, %v2219_v24  ;;  %v4007_v36 = vpop.f32.mrb[74].mxu1  ;;  %v1570_v15 = vpop.f32.mrb[75].mxu0 }
 0x1b6   : >> { %v2217_v19 = vmul.f32 %v4474_v0, %v1938_v63  ;;  %v3699_v10 = vpack.c.bf16 %v3032_v12, %v3032_v12  ;;  %v5973_v47 = vmax.f32 %v4758_v45, 0.0  ;;  %v5974_v13 = vmax.f32 %v5094_v5, 0.0  ;;  %v1954_v4 = vpop.f32.mrb[75].mxu1 }
 0x1b7   : >> { %2796 = vst.msk [vmem:[#allocation2 + $0x208] sm:$0xff] %vm2666_vm3, %v2764_v22  ;;  %2737 = vst.msk [vmem:[#allocation2 + $0x130] sm:$0xff] %vm2666_vm3, %v2705_v34  ;;  %v2769_v35 = vmax.f32 %v5972_v59, %v2608_v29  ;;  %v2513_v26 = vmax.f32 %v2321_v20, 0.0  ;;  %v2609_v61 = vmax.f32 %v2417_v31, 0.0  ;;  %v2319_v63 = vadd.f32 %v4479_v1, %v2121_v50  ;;  %v5977_v50 = vld [vmem:[#allocation6_spill] sm:$0xff] }
 0x1b8   : >> { %v2703_v42 = vmax.f32 %v2510_v16, %v5973_v47  ;;  %v2767_v25 = vmax.f32 %v5974_v13, %v2606_v37  ;;  %v2861_v54 = vld [vmem:[#allocation2 + $0x110] ss:$2 sm:$0xff]  ;;  %v2957_v14 = vld [vmem:[#allocation2 + $0x111] ss:$2 sm:$0xff]  ;;  %v2415_v9 = vadd.f32 %v4479_v1, %v2217_v19  ;;  %v2126_v57 = vmul.f32 %v3910_v21, %v4474_v0  ;;  %3277 = vst.msk [vmem:[%s5109_s11 + $0x38] sm:$0xf] %vm3262_vm4, %v3699_v10 }
 0x1b9   : >> { %2801 = vst.msk [vmem:[#allocation2 + $0x230] sm:$0xff] %vm2666_vm3, %v2769_v35  ;;  %v3035_v45 = vmax.f32 %v2861_v54, %v2957_v14  ;;  %v5975_v5 = vmax.f32 %v4773_v56, 0.0  ;;  %v2222_v32 = vmul.f32 %v4006_v60, %v4474_v0  ;;  %v2124_v22 = vmul.f32 %v4474_v0, %v1567_v48 }
 0x1ba   : >> { %2735 = vst.msk [vmem:[#allocation2 + $0x120] sm:$0xff] %vm2666_vm3, %v2703_v42  ;;  %2799 = vst.msk [vmem:[#allocation2 + $0x220] sm:$0xff] %vm2666_vm3, %v2767_v25  ;;  %v2893_v34 = vld [vmem:[#allocation2 + $0x210] ss:$2 sm:$0xff]  ;;  %v2989_v29 = vld [vmem:[#allocation2 + $0x211] ss:$2 sm:$0xff]  ;;  %v2324_v20 = vadd.f32 %v4479_v1, %v2126_v57  ;;  %v2220_v42 = vmul.f32 %v4474_v0, %v1951_v38  ;;  %v2127_v38 = vmul.f32 %v3911_v51, %v4474_v0 }
 0x1bb   : >> { %v2706_v43 = vmax.f32 %v2513_v26, %v5975_v5  ;;  %v5976_v24 = vmax.f32 %v5102_v8, 0.0  ;;  %v2511_v16 = vmax.f32 %v2319_v63, 0.0  ;;  %v2607_v37 = vmax.f32 %v2415_v9, 0.0  ;;  %v5980_v9 = vld [vmem:[#allocation7_spill] sm:$0xff]  ;;  %v3914_v5 = vpop.f32.mrb[76].mxu0 }
 0x1bc   : >> { %v3702_v21 = vpack.c.bf16 %v3035_v45, %v3035_v45  ;;  %v3051_v59 = vmax.f32 %v2893_v34, %v2989_v29  ;;  %v2420_v56 = vadd.f32 %v4479_v1, %v2222_v32  ;;  %v2322_v60 = vadd.f32 %v4479_v1, %v2124_v22  ;;  %v2859_v35 = vld [vmem:[#allocation2 + $0x100] ss:$2 sm:$0xff]  ;;  %v2955_v31 = vld [vmem:[#allocation2 + $0x101] ss:$2 sm:$0xff]  ;;  %v5983_v29 = vld [vmem:[#allocation8_spill] sm:$0xff] }
 0x1bd   : >> { %v2770_v12 = vmax.f32 %v5976_v24, %v2609_v61  ;;  %2738 = vst.msk [vmem:[#allocation2 + $0x138] sm:$0xff] %vm2666_vm3, %v2706_v43  ;;  %v5978_v8 = vmax.f32 %v5977_v50, 0.0  ;;  %v5979_v48 = vmax.f32 %v5113_v44, 0.0  ;;  %v2516_v47 = vmax.f32 %v2324_v20, 0.0  ;;  %v4010_v43 = vpop.f32.mrb[76].mxu1 }
 0x1be   : >> { %3280 = vst.msk [vmem:[%s5109_s11 + $0x44] sm:$0xf] %vm3262_vm4, %v3702_v21  ;;  %v3718_v13 = vpack.c.bf16 %v3051_v59, %v3051_v59  ;;  %v3034_v25 = vmax.f32 %v2859_v35, %v2955_v31  ;;  %v2891_v26 = vld [vmem:[#allocation2 + $0x200] ss:$2 sm:$0xff]  ;;  %v2987_v54 = vld [vmem:[#allocation2 + $0x201] ss:$2 sm:$0xff]  ;;  %v2418_v45 = vadd.f32 %v4479_v1, %v2220_v42  ;;  %v2325_v59 = vadd.f32 %v4479_v1, %v2127_v38 }
 0x1bf   : >> { %2802 = vst.msk [vmem:[#allocation2 + $0x238] sm:$0xff] %vm2666_vm3, %v2770_v12  ;;  %v2704_v19 = vmax.f32 %v2511_v16, %v5978_v8  ;;  %v2768_v10 = vmax.f32 %v5979_v48, %v2607_v37  ;;  %v2612_v14 = vmax.f32 %v2420_v56, 0.0  ;;  %v2514_v61 = vmax.f32 %v2322_v60, 0.0  ;;  %v1583_v37 = vpop.f32.mrb[77].mxu0  ;;  %v1967_v20 = vpop.f32.mrb[77].mxu1 }
 0x1c0   : >> { %v3050_v63 = vmax.f32 %v2891_v26, %v2987_v54  ;;  %v5981_v44 = vmax.f32 %v5980_v9, 0.0  ;;  %3296 = vst.msk [vmem:[%s5109_s11 + $0x84] sm:$0xf] %vm3262_vm4, %v3718_v13  ;;  %v3701_v32 = vpack.c.bf16 %v3034_v25, %v3034_v25  ;;  %v5982_v22 = vmax.f32 %v5116_v49, 0.0  ;;  %v3915_v60 = vpop.f32.mrb[78].mxu0  ;;  %v5487_v35 = vpop.f32.mrb[78].mxu1 }
 0x1c1   : >> { %2736 = vst.msk [vmem:[#allocation2 + $0x128] sm:$0xff] %vm2666_vm3, %v2704_v19  ;;  %2800 = vst.msk [vmem:[#allocation2 + $0x228] sm:$0xff] %vm2666_vm3, %v2768_v10  ;;  %v5984_v24 = vmax.f32 %v5983_v29, 0.0  ;;  %v2223_v16 = vmul.f32 %v4007_v36, %v4474_v0  ;;  %v2610_v51 = vmax.f32 %v2418_v45, 0.0  ;;  %v2125_v56 = vmul.f32 %v4474_v0, %v1570_v15  ;;  %v1586_v8 = vpop.f32.mrb[79].mxu0  ;;  %v5497_v19 = vpop.f32.mrb[79].mxu1 }
 0x1c2   : >> { %v2709_v57 = vmax.f32 %v2516_v47, %v5981_v44  ;;  %v2773_v34 = vmax.f32 %v5982_v22, %v2612_v14  ;;  %v3717_v21 = vpack.c.bf16 %v3050_v63, %v3050_v63  ;;  %3279 = vst.msk [vmem:[%s5109_s11 + $0x40] sm:$0xf] %vm3262_vm4, %v3701_v32  ;;  %v2221_v36 = vmul.f32 %v4474_v0, %v1954_v4  ;;  %v5986_v44 = vld [vmem:[#allocation9_spill] sm:$0xff] }
 0x1c3   : >> { %v2707_v12 = vmax.f32 %v2514_v61, %v5984_v24  ;;  %v2421_v49 = vadd.f32 %v4479_v1, %v2223_v16  ;;  %v2130_v31 = vmul.f32 %v3914_v5, %v4474_v0  ;;  %v2226_v50 = vmul.f32 %v4010_v43, %v4474_v0 }
 0x1c4   : >> { %2741 = vst.msk [vmem:[#allocation2 + $0x150] sm:$0xff] %vm2666_vm3, %v2709_v57  ;;  %2805 = vst.msk [vmem:[#allocation2 + $0x250] sm:$0xff] %vm2666_vm3, %v2773_v34  ;;  %v2865_v15 = vld [vmem:[#allocation2 + $0x130] ss:$2 sm:$0xff]  ;;  %v2961_v48 = vld [vmem:[#allocation2 + $0x131] ss:$2 sm:$0xff]  ;;  %v2323_v13 = vadd.f32 %v4479_v1, %v2125_v56  ;;  %v2128_v25 = vmul.f32 %v4474_v0, %v1583_v37  ;;  %v2419_v61 = vadd.f32 %v4479_v1, %v2221_v36 }
 0x1c5   : >> { %2739 = vst.msk [vmem:[#allocation2 + $0x140] sm:$0xff] %vm2666_vm3, %v2707_v12  ;;  %v5985_v10 = vmax.f32 %v5123_v40, 0.0  ;;  %v2517_v42 = vmax.f32 %v2325_v59, 0.0  ;;  %v3037_v4 = vmax.f32 %v2865_v15, %v2961_v48  ;;  %v2613_v14 = vmax.f32 %v2421_v49, 0.0  ;;  %v3918_v36 = vpop.f32.mrb[80].mxu0 }
 0x1c6   : >> { %3295 = vst.msk [vmem:[%s5109_s11 + $0x80] sm:$0xf] %vm3262_vm4, %v3717_v21  ;;  %v2897_v26 = vld [vmem:[#allocation2 + $0x230] ss:$2 sm:$0xff]  ;;  %v2993_v54 = vld [vmem:[#allocation2 + $0x231] ss:$2 sm:$0xff]  ;;  %v2328_v63 = vadd.f32 %v4479_v1, %v2130_v31  ;;  %v2424_v38 = vadd.f32 %v4479_v1, %v2226_v50  ;;  %v2326_v24 = vadd.f32 %v4479_v1, %v2128_v25  ;;  %v2224_v12 = vmul.f32 %v4474_v0, %v1967_v20 }
 0x1c7   : >> { %v2771_v47 = vmax.f32 %v5985_v10, %v2610_v51  ;;  %v3053_v9 = vmax.f32 %v2897_v26, %v2993_v54  ;;  %v5987_v57 = vmax.f32 %v5986_v44, 0.0  ;;  %v2515_v45 = vmax.f32 %v2323_v13, 0.0  ;;  %v5989_v51 = vld [vmem:[#allocation10_spill] sm:$0xff]  ;;  %v4014_v31 = vpop.f32.mrb[80].mxu1  ;;  %v1599_v48 = vpop.f32.mrb[81].mxu0 }
 0x1c8   : >> { %v3704_v5 = vpack.c.bf16 %v3037_v4, %v3037_v4  ;;  %v2863_v43 = vld [vmem:[#allocation2 + $0x120] ss:$2 sm:$0xff]  ;;  %v2959_v32 = vld [vmem:[#allocation2 + $0x121] ss:$2 sm:$0xff]  ;;  %v5988_v34 = vmax.f32 %v5142_v18, 0.0  ;;  %v5990_v59 = vmax.f32 %v5989_v51, 0.0  ;;  %v2422_v25 = vadd.f32 %v4479_v1, %v2224_v12 }
 0x1c9   : >> { %2803 = vst.msk [vmem:[#allocation2 + $0x240] sm:$0xff] %vm2666_vm3, %v2771_v47  ;;  %v2710_v40 = vmax.f32 %v2517_v42, %v5987_v57  ;;  %v2895_v22 = vld [vmem:[#allocation2 + $0x220] ss:$2 sm:$0xff]  ;;  %v3720_v16 = vpack.c.bf16 %v3053_v9, %v3053_v9  ;;  %v3036_v37 = vmax.f32 %v2863_v43, %v2959_v32  ;;  %v2991_v21 = vld [vmem:[#allocation2 + $0x221] ss:$2 sm:$0xff]  ;;  %v2611_v49 = vmax.f32 %v2419_v61, 0.0 }
 0x1ca   : >> { %v2774_v29 = vmax.f32 %v5988_v34, %v2613_v14  ;;  %v2708_v56 = vmax.f32 %v2515_v45, %v5990_v59  ;;  %3282 = vst.msk [vmem:[%s5109_s11 + $0x4c] sm:$0xf] %vm3262_vm4, %v3704_v5  ;;  %v3052_v18 = vmax.f32 %v2895_v22, %v2991_v21  ;;  %v2520_v50 = vmax.f32 %v2328_v63, 0.0  ;;  %v1983_v10 = vpop.f32.mrb[81].mxu1  ;;  %v5528_v26 = vpop.f32.mrb[82].mxu0  ;;  %v5992_v61 = vld [vmem:[#allocation11_spill] sm:$0xff] }
 0x1cb   : >> { %2742 = vst.msk [vmem:[#allocation2 + $0x158] sm:$0xff] %vm2666_vm3, %v2710_v40  ;;  %v2616_v15 = vmax.f32 %v2424_v38, 0.0  ;;  %v2518_v20 = vmax.f32 %v2326_v24, 0.0  ;;  %v3703_v47 = vpack.c.bf16 %v3036_v37, %v3036_v37  ;;  %v5991_v42 = vmax.f32 %v5148_v6, 0.0  ;;  %v5530_v54 = vpop.f32.mrb[82].mxu1  ;;  %v5995_v40 = vld [vmem:[#allocation12_spill] sm:$0xff] }
 0x1cc   : >> { %2806 = vst.msk [vmem:[#allocation2 + $0x258] sm:$0xff] %vm2666_vm3, %v2774_v29  ;;  %2740 = vst.msk [vmem:[#allocation2 + $0x148] sm:$0xff] %vm2666_vm3, %v2708_v56  ;;  %v2131_v4 = vmul.f32 %v3915_v60, %v4474_v0  ;;  %v3719_v14 = vpack.c.bf16 %v3052_v18, %v3052_v18  ;;  %v5993_v63 = vmax.f32 %v5992_v61, 0.0  ;;  %v5994_v44 = vmax.f32 %v5157_v28, 0.0  ;;  %v5538_v38 = vpop.f32.mrb[83].mxu0  ;;  %v5540_v5 = vpop.f32.mrb[83].mxu1 }
 0x1cd   : >> { %3298 = vst.msk [vmem:[%s5109_s11 + $0x8c] sm:$0xf] %vm3262_vm4, %v3720_v16  ;;  %v2772_v13 = vmax.f32 %v5991_v42, %v2611_v49  ;;  %v5996_v45 = vmax.f32 %v5995_v40, 0.0  ;;  %3281 = vst.msk [vmem:[%s5109_s11 + $0x48] sm:$0xf] %vm3262_vm4, %v3703_v47  ;;  %v2614_v60 = vmax.f32 %v2422_v25, 0.0  ;;  %v2227_v32 = vmul.f32 %v5487_v35, %v4474_v0 }
 0x1ce   : >> { %v2713_v9 = vmax.f32 %v2520_v50, %v5993_v63  ;;  %v2777_v57 = vmax.f32 %v5994_v44, %v2616_v15  ;;  %v2329_v43 = vadd.f32 %v4479_v1, %v2131_v4  ;;  %v2129_v28 = vmul.f32 %v4474_v0, %v1586_v8  ;;  %3297 = vst.msk [vmem:[%s5109_s11 + $0x88] sm:$0xf] %vm3262_vm4, %v3719_v14  ;;  %v5997_v35 = vld [vmem:[#allocation31_spill] sm:$0xff]  ;;  %v4018_v18 = vpop.f32.mrb[84].mxu1 }
 0x1cf   : >> { %v2711_v6 = vmax.f32 %v2518_v20, %v5996_v45  ;;  %2804 = vst.msk [vmem:[#allocation2 + $0x248] sm:$0xff] %vm2666_vm3, %v2772_v13  ;;  %v2225_v22 = vmul.f32 %v4474_v0, %v5497_v19  ;;  %v2134_v34 = vmul.f32 %v3918_v36, %v4474_v0  ;;  %v2230_v29 = vmul.f32 %v4014_v31, %v4474_v0  ;;  %v3922_v31 = vpop.f32.mrb[84].mxu0 }
 0x1d0   : >> { %2745 = vst.msk [vmem:[#allocation2 + $0x170] sm:$0xff] %vm2666_vm3, %v2713_v9  ;;  %2809 = vst.msk [vmem:[#allocation2 + $0x270] sm:$0xff] %vm2666_vm3, %v2777_v57  ;;  %v2132_v24 = vmul.f32 %v4474_v0, %v1599_v48  ;;  %v5998_v12 = vmax.f32 %v5997_v35, 0.0  ;;  %v2521_v16 = vmax.f32 %v2329_v43, 0.0  ;;  %v2425_v37 = vadd.f32 %v4479_v1, %v2227_v32  ;;  %v5999_v48 = vld [vmem:[#allocation13_spill] sm:$0xff] }
 0x1d1   : >> { %2743 = vst.msk [vmem:[#allocation2 + $0x160] sm:$0xff] %vm2666_vm3, %v2711_v6  ;;  %v2327_v21 = vadd.f32 %v4479_v1, %v2129_v28  ;;  %v2423_v56 = vadd.f32 %v4479_v1, %v2225_v22  ;;  %v2332_v19 = vadd.f32 %v4479_v1, %v2134_v34  ;;  %v2428_v49 = vadd.f32 %v4479_v1, %v2230_v29  ;;  %v1615_v28 = vpop.f32.mrb[85].mxu0  ;;  %v1999_v22 = vpop.f32.mrb[85].mxu1 }
 0x1d2   : >> { %v2775_v8 = vmax.f32 %v5998_v12, %v2614_v60  ;;  %v2869_v51 = vld [vmem:[#allocation2 + $0x150] ss:$2 sm:$0xff]  ;;  %v2965_v59 = vld [vmem:[#allocation2 + $0x151] ss:$2 sm:$0xff]  ;;  %v2330_v36 = vadd.f32 %v4479_v1, %v2132_v24  ;;  %v6000_v47 = vmax.f32 %v5999_v48, 0.0  ;;  %v2617_v13 = vmax.f32 %v2425_v37, 0.0 }
 0x1d3   : >> { %v3039_v50 = vmax.f32 %v2869_v51, %v2965_v59  ;;  %v2901_v15 = vld [vmem:[#allocation2 + $0x250] ss:$2 sm:$0xff]  ;;  %v2997_v20 = vld [vmem:[#allocation2 + $0x251] ss:$2 sm:$0xff]  ;;  %v2519_v25 = vmax.f32 %v2327_v21, 0.0  ;;  %v2615_v63 = vmax.f32 %v2423_v56, 0.0  ;;  %v2228_v44 = vmul.f32 %v4474_v0, %v1983_v10 }
 0x1d4   : >> { %2807 = vst.msk [vmem:[#allocation2 + $0x260] sm:$0xff] %vm2666_vm3, %v2775_v8  ;;  %v2714_v42 = vmax.f32 %v2521_v16, %v6000_v47  ;;  %v3055_v4 = vmax.f32 %v2901_v15, %v2997_v20  ;;  %v2867_v14 = vld [vmem:[#allocation2 + $0x140] ss:$2 sm:$0xff]  ;;  %v2963_v61 = vld [vmem:[#allocation2 + $0x141] ss:$2 sm:$0xff]  ;;  %v2524_v9 = vmax.f32 %v2332_v19, 0.0  ;;  %v2135_v15 = vmul.f32 %v5528_v26, %v4474_v0 }
 0x1d5   : >> { %v3706_v57 = vpack.c.bf16 %v3039_v50, %v3039_v50  ;;  %v3038_v40 = vmax.f32 %v2867_v14, %v2963_v61  ;;  %v6001_v45 = vmax.f32 %v5185_v27, 0.0  ;;  %v6002_v60 = vld [vmem:[#allocation14_spill] sm:$0xff]  ;;  %v6004_v35 = vmax.f32 %v5191_v62, 0.0  ;;  %v6005_v10 = vld [vmem:[#allocation15_spill] sm:$0xff]  ;;  %v5580_v21 = vpop.f32.mrb[86].mxu0  ;;  %v5587_v62 = vpop.f32.mrb[86].mxu1 }
 0x1d6   : >> { %2746 = vst.msk [vmem:[#allocation2 + $0x178] sm:$0xff] %vm2666_vm3, %v2714_v42  ;;  %v6003_v43 = vmax.f32 %v6002_v60, 0.0  ;;  %v3722_v34 = vpack.c.bf16 %v3055_v4, %v3055_v4  ;;  %v2899_v29 = vld [vmem:[#allocation2 + $0x240] ss:$2 sm:$0xff]  ;;  %v2995_v24 = vld [vmem:[#allocation2 + $0x241] ss:$2 sm:$0xff]  ;;  %v2426_v56 = vadd.f32 %v4479_v1, %v2228_v44  ;;  %v2133_v20 = vmul.f32 %v4474_v0, %v5538_v38 }
 0x1d7   : >> { %v2778_v6 = vmax.f32 %v6001_v45, %v2617_v13  ;;  %v2776_v12 = vmax.f32 %v6004_v35, %v2615_v63  ;;  %v6006_v8 = vmax.f32 %v6005_v10, 0.0  ;;  %v2620_v37 = vmax.f32 %v2428_v49, 0.0  ;;  %3284 = vst.msk [vmem:[%s5109_s11 + $0x54] sm:$0xf] %vm3262_vm4, %v3706_v57  ;;  %v5589_v19 = vpop.f32.mrb[87].mxu0  ;;  %v5603_v48 = vpop.f32.mrb[87].mxu1 }
 0x1d8   : >> { %v2712_v32 = vmax.f32 %v2519_v25, %v6003_v43  ;;  %v3705_v27 = vpack.c.bf16 %v3038_v40, %v3038_v40  ;;  %v3054_v51 = vmax.f32 %v2899_v29, %v2995_v24  ;;  %v2522_v59 = vmax.f32 %v2330_v36, 0.0  ;;  %3300 = vst.msk [vmem:[%s5109_s11 + $0x94] sm:$0xf] %vm3262_vm4, %v3722_v34  ;;  %v6008_v42 = vld [vmem:[#allocation16_spill] sm:$0xff]  ;;  %v5616_v61 = vpop.f32.mrb[88].mxu0  ;;  %v5618_v63 = vpop.f32.mrb[88].mxu1 }
 0x1d9   : >> { %v2717_v16 = vmax.f32 %v2524_v9, %v6006_v8  ;;  %2810 = vst.msk [vmem:[#allocation2 + $0x278] sm:$0xff] %vm2666_vm3, %v2778_v6  ;;  %2808 = vst.msk [vmem:[#allocation2 + $0x268] sm:$0xff] %vm2666_vm3, %v2776_v12  ;;  %v6007_v49 = vmax.f32 %v5202_v41, 0.0  ;;  %v2231_v36 = vmul.f32 %v5530_v54, %v4474_v0  ;;  %v6009_v13 = vmax.f32 %v6008_v42, 0.0  ;;  %v5628_v45 = vpop.f32.mrb[89].mxu0  ;;  %v6014_v42 = vld [vmem:[#allocation18_spill] sm:$0xff] }
 0x1da   : >> { %2744 = vst.msk [vmem:[#allocation2 + $0x168] sm:$0xff] %vm2666_vm3, %v2712_v32  ;;  %v3721_v47 = vpack.c.bf16 %v3054_v51, %v3054_v51  ;;  %v2618_v41 = vmax.f32 %v2426_v56, 0.0  ;;  %v2229_v4 = vmul.f32 %v4474_v0, %v5540_v5  ;;  %v2333_v26 = vadd.f32 %v4479_v1, %v2135_v15 }
 0x1db   : >> { %2749 = vst.msk [vmem:[#allocation2 + $0x190] sm:$0xff] %vm2666_vm3, %v2717_v16  ;;  %v2781_v50 = vmax.f32 %v6007_v49, %v2620_v37  ;;  %v2715_v25 = vmax.f32 %v2522_v59, %v6009_v13  ;;  %v2429_v54 = vadd.f32 %v4479_v1, %v2231_v36  ;;  %v2331_v38 = vadd.f32 %v4479_v1, %v2133_v20  ;;  %v6011_v37 = vld [vmem:[#allocation17_spill] sm:$0xff] }
 0x1dc   : >> { %3283 = vst.msk [vmem:[%s5109_s11 + $0x50] sm:$0xf] %vm3262_vm4, %v3705_v27  ;;  %v2138_v14 = vmul.f32 %v3922_v31, %v4474_v0  ;;  %3299 = vst.msk [vmem:[%s5109_s11 + $0x90] sm:$0xf] %vm3262_vm4, %v3721_v47  ;;  %v6010_v5 = vmax.f32 %v5209_v33, 0.0  ;;  %v2427_v44 = vadd.f32 %v4479_v1, %v2229_v4  ;;  %v2234_v57 = vmul.f32 %v4018_v18, %v4474_v0  ;;  %v5630_v31 = vpop.f32.mrb[89].mxu1 }
 0x1dd   : >> { %2813 = vst.msk [vmem:[#allocation2 + $0x290] sm:$0xff] %vm2666_vm3, %v2781_v50  ;;  %2747 = vst.msk [vmem:[#allocation2 + $0x180] sm:$0xff] %vm2666_vm3, %v2715_v25  ;;  %v2136_v40 = vmul.f32 %v4474_v0, %v1615_v28  ;;  %v2873_v6 = vld [vmem:[#allocation2 + $0x170] ss:$2 sm:$0xff]  ;;  %v2969_v60 = vld [vmem:[#allocation2 + $0x171] ss:$2 sm:$0xff]  ;;  %v2232_v29 = vmul.f32 %v4474_v0, %v1999_v22 }
 0x1de   : >> { %v2779_v9 = vmax.f32 %v6010_v5, %v2618_v41  ;;  %v2525_v43 = vmax.f32 %v2333_v26, 0.0  ;;  %v2621_v32 = vmax.f32 %v2429_v54, 0.0  ;;  %v2336_v34 = vadd.f32 %v4479_v1, %v2138_v14  ;;  %v5636_v28 = vpop.f32.mrb[90].mxu0  ;;  %v5638_v12 = vpop.f32.mrb[90].mxu1 }
 0x1df   : >> { %v3041_v33 = vmax.f32 %v2873_v6, %v2969_v60  ;;  %v2523_v24 = vmax.f32 %v2331_v38, 0.0  ;;  %v2619_v35 = vmax.f32 %v2427_v44, 0.0  ;;  %v2432_v18 = vadd.f32 %v4479_v1, %v2234_v57  ;;  %v1634_v14 = vpop.f32.mrb[91].mxu0  ;;  %v2018_v5 = vpop.f32.mrb[91].mxu1  ;;  %v6017_v60 = vld [vmem:[#allocation19_spill] sm:$0xff] }
 0x1e0   : >> { %2811 = vst.msk [vmem:[#allocation2 + $0x280] sm:$0xff] %vm2666_vm3, %v2779_v9  ;;  %v2905_v10 = vld [vmem:[#allocation2 + $0x270] ss:$2 sm:$0xff]  ;;  %v3001_v8 = vld [vmem:[#allocation2 + $0x271] ss:$2 sm:$0xff]  ;;  %v6012_v27 = vmax.f32 %v6011_v37, 0.0  ;;  %v2334_v56 = vadd.f32 %v4479_v1, %v2136_v40  ;;  %v2430_v49 = vadd.f32 %v4479_v1, %v2232_v29  ;;  %v2139_v57 = vmul.f32 %v5580_v21, %v4474_v0 }
 0x1e1   : >> { %v2871_v16 = vld [vmem:[#allocation2 + $0x160] ss:$2 sm:$0xff]  ;;  %v6013_v59 = vmax.f32 %v5223_v58, 0.0  ;;  %v3708_v50 = vpack.c.bf16 %v3041_v33, %v3041_v33  ;;  %v3057_v15 = vmax.f32 %v2905_v10, %v3001_v8  ;;  %v2967_v36 = vld [vmem:[#allocation2 + $0x161] ss:$2 sm:$0xff]  ;;  %v6015_v13 = vmax.f32 %v6014_v42, 0.0 }
 0x1e2   : >> { %v2718_v51 = vmax.f32 %v2525_v43, %v6012_v27  ;;  %v2903_v20 = vld [vmem:[#allocation2 + $0x260] ss:$2 sm:$0xff]  ;;  %v2999_v47 = vld [vmem:[#allocation2 + $0x261] ss:$2 sm:$0xff]  ;;  %v6016_v41 = vmax.f32 %v5233_v46, 0.0  ;;  %v3040_v26 = vmax.f32 %v2871_v16, %v2967_v36  ;;  %v2528_v58 = vmax.f32 %v2336_v34, 0.0 }
 0x1e3   : >> { %v2782_v22 = vmax.f32 %v6013_v59, %v2621_v32  ;;  %v2716_v25 = vmax.f32 %v2523_v24, %v6015_v13  ;;  %v3056_v54 = vmax.f32 %v2903_v20, %v2999_v47  ;;  %v2624_v38 = vmax.f32 %v2432_v18, 0.0  ;;  %3286 = vst.msk [vmem:[%s5109_s11 + $0x5c] sm:$0xf] %vm3262_vm4, %v3708_v50  ;;  %v5662_v33 = vpop.f32.mrb[92].mxu0  ;;  %v5664_v24 = vpop.f32.mrb[92].mxu1 }
 0x1e4   : >> { %v2780_v4 = vmax.f32 %v6016_v41, %v2619_v35  ;;  %2750 = vst.msk [vmem:[#allocation2 + $0x198] sm:$0xff] %vm2666_vm3, %v2718_v51  ;;  %v3724_v9 = vpack.c.bf16 %v3057_v15, %v3057_v15  ;;  %v2526_v46 = vmax.f32 %v2334_v56, 0.0  ;;  %v2622_v44 = vmax.f32 %v2430_v49, 0.0  ;;  %v6020_v35 = vld [vmem:[#allocation20_spill] sm:$0xff]  ;;  %v5675_v27 = vpop.f32.mrb[93].mxu0  ;;  %v6023_v41 = vld [vmem:[#allocation21_spill] sm:$0xff] }
 0x1e5   : >> { %2814 = vst.msk [vmem:[#allocation2 + $0x298] sm:$0xff] %vm2666_vm3, %v2782_v22  ;;  %2748 = vst.msk [vmem:[#allocation2 + $0x188] sm:$0xff] %vm2666_vm3, %v2716_v25  ;;  %v3707_v40 = vpack.c.bf16 %v3040_v26, %v3040_v26  ;;  %v3723_v6 = vpack.c.bf16 %v3056_v54, %v3056_v54  ;;  %v6018_v43 = vmax.f32 %v6017_v60, 0.0  ;;  %v6019_v34 = vmax.f32 %v5248_v55, 0.0  ;;  %v5677_v55 = vpop.f32.mrb[93].mxu1  ;;  %v5693_v22 = vpop.f32.mrb[94].mxu0 }
 0x1e6   : >> { %2812 = vst.msk [vmem:[#allocation2 + $0x288] sm:$0xff] %vm2666_vm3, %v2780_v4  ;;  %v6021_v18 = vmax.f32 %v6020_v35, 0.0  ;;  %v6022_v8 = vmax.f32 %v5254_v17, 0.0  ;;  %v2337_v16 = vadd.f32 %v4479_v1, %v2139_v57  ;;  %v2235_v37 = vmul.f32 %v5587_v62, %v4474_v0  ;;  %v5695_v56 = vpop.f32.mrb[94].mxu1  ;;  %v5704_v50 = vpop.f32.mrb[95].mxu0 }
 0x1e7   : >> { %v2721_v32 = vmax.f32 %v2528_v58, %v6018_v43  ;;  %v2785_v29 = vmax.f32 %v6019_v34, %v2624_v38  ;;  %3302 = vst.msk [vmem:[%s5109_s11 + $0x9c] sm:$0xf] %vm3262_vm4, %v3724_v9  ;;  %3285 = vst.msk [vmem:[%s5109_s11 + $0x58] sm:$0xf] %vm3262_vm4, %v3707_v40  ;;  %v2137_v17 = vmul.f32 %v4474_v0, %v5589_v19 }
 0x1e8   : >> { %v2719_v10 = vmax.f32 %v2526_v46, %v6021_v18  ;;  %v2783_v21 = vmax.f32 %v6022_v8, %v2622_v44  ;;  %3301 = vst.msk [vmem:[%s5109_s11 + $0x98] sm:$0xf] %vm3262_vm4, %v3723_v6  ;;  %v2233_v51 = vmul.f32 %v4474_v0, %v5603_v48  ;;  %v2142_v62 = vmul.f32 %v5616_v61, %v4474_v0 }
 0x1e9   : >> { %2753 = vst.msk [vmem:[#allocation2 + $0x1b0] sm:$0xff] %vm2666_vm3, %v2721_v32  ;;  %2817 = vst.msk [vmem:[#allocation2 + $0x2b0] sm:$0xff] %vm2666_vm3, %v2785_v29  ;;  %v2238_v59 = vmul.f32 %v5618_v63, %v4474_v0  ;;  %v2529_v49 = vmax.f32 %v2337_v16, 0.0  ;;  %v2433_v19 = vadd.f32 %v4479_v1, %v2235_v37  ;;  %v2140_v48 = vmul.f32 %v4474_v0, %v5628_v45  ;;  %v5706_v63 = vpop.f32.mrb[95].mxu1 }
 0x1ea   : >> { %2751 = vst.msk [vmem:[#allocation2 + $0x1a0] sm:$0xff] %vm2666_vm3, %v2719_v10  ;;  %2815 = vst.msk [vmem:[#allocation2 + $0x2a0] sm:$0xff] %vm2666_vm3, %v2783_v21  ;;  %v2236_v61 = vmul.f32 %v4474_v0, %v5630_v31  ;;  %v2335_v15 = vadd.f32 %v4479_v1, %v2137_v17  ;;  %v2431_v36 = vadd.f32 %v4479_v1, %v2233_v51  ;;  %v6024_v45 = vmax.f32 %v6023_v41, 0.0  ;;  %v6026_v21 = vld [vmem:[#allocation22_spill] sm:$0xff] }
 0x1eb   : >> { %v2340_v20 = vadd.f32 %v4479_v1, %v2142_v62  ;;  %v2436_v47 = vadd.f32 %v4479_v1, %v2238_v59  ;;  %v2877_v42 = vld [vmem:[#allocation2 + $0x190] ss:$2 sm:$0xff]  ;;  %v2973_v13 = vld [vmem:[#allocation2 + $0x191] ss:$2 sm:$0xff]  ;;  %v2338_v31 = vadd.f32 %v4479_v1, %v2140_v48  ;;  %v2143_v54 = vmul.f32 %v5636_v28, %v4474_v0  ;;  %v6029_v59 = vld [vmem:[#allocation23_spill] sm:$0xff] }
 0x1ec   : >> { %v2909_v25 = vld [vmem:[#allocation2 + $0x290] ss:$2 sm:$0xff]  ;;  %v2722_v4 = vmax.f32 %v2529_v49, %v6024_v45  ;;  %v2434_v26 = vadd.f32 %v4479_v1, %v2236_v61  ;;  %v3043_v58 = vmax.f32 %v2877_v42, %v2973_v13  ;;  %v3005_v38 = vld [vmem:[#allocation2 + $0x291] ss:$2 sm:$0xff]  ;;  %v2875_v9 = vld [vmem:[#allocation2 + $0x180] ss:$2 sm:$0xff]  ;;  %v2239_v44 = vmul.f32 %v5638_v12, %v4474_v0 }
 0x1ed   : >> { %v2971_v46 = vld [vmem:[#allocation2 + $0x181] ss:$2 sm:$0xff]  ;;  %v2141_v57 = vmul.f32 %v4474_v0, %v1634_v14  ;;  %v2237_v40 = vmul.f32 %v4474_v0, %v2018_v5  ;;  %v3059_v6 = vmax.f32 %v2909_v25, %v3005_v38  ;;  %v2907_v43 = vld [vmem:[#allocation2 + $0x280] ss:$2 sm:$0xff]  ;;  %v2625_v28 = vmax.f32 %v2433_v19, 0.0  ;;  %v6032_v25 = vld [vmem:[#allocation24_spill] sm:$0xff] }
 0x1ee   : >> { %v3042_v60 = vmax.f32 %v2875_v9, %v2971_v46  ;;  %v3003_v32 = vld [vmem:[#allocation2 + $0x281] ss:$2 sm:$0xff]  ;;  %2754 = vst.msk [vmem:[#allocation2 + $0x1b8] sm:$0xff] %vm2666_vm3, %v2722_v4  ;;  %v2527_v34 = vmax.f32 %v2335_v15, 0.0  ;;  %v3710_v29 = vpack.c.bf16 %v3043_v58, %v3043_v58  ;;  %v2623_v18 = vmax.f32 %v2431_v36, 0.0  ;;  %v6034_v4 = vld [vmem:[#allocation32_spill] sm:$0xff] }
 0x1ef   : >> { %v3058_v35 = vmax.f32 %v2907_v43, %v3003_v32  ;;  %v2532_v10 = vmax.f32 %v2340_v20, 0.0  ;;  %v3726_v12 = vpack.c.bf16 %v3059_v6, %v3059_v6  ;;  %v6025_v14 = vmax.f32 %v5265_v53, 0.0  ;;  %v6038_v43 = vld [vmem:[#allocation33_spill] sm:$0xff] }
 0x1f0   : >> { %v3709_v8 = vpack.c.bf16 %v3042_v60, %v3042_v60  ;;  %v6027_v16 = vmax.f32 %v6026_v21, 0.0  ;;  %3288 = vst.msk [vmem:[%s5109_s11 + $0x64] sm:$0xf] %vm3262_vm4, %v3710_v29  ;;  %v6028_v51 = vmax.f32 %v5283_v11, 0.0  ;;  %v6030_v49 = vmax.f32 %v6029_v59, 0.0  ;;  %v6040_v29 = vld [vmem:[#allocation26_spill] sm:$0xff] }
 0x1f1   : >> { %v2786_v5 = vmax.f32 %v6025_v14, %v2625_v28  ;;  %v3725_v17 = vpack.c.bf16 %v3058_v35, %v3058_v35  ;;  %v2628_v48 = vmax.f32 %v2436_v47, 0.0  ;;  %3304 = vst.msk [vmem:[%s5109_s11 + $0xa4] sm:$0xf] %vm3262_vm4, %v3726_v12  ;;  %v2530_v53 = vmax.f32 %v2338_v31, 0.0 }
 0x1f2   : >> { %v2720_v37 = vmax.f32 %v2527_v34, %v6027_v16  ;;  %v2784_v62 = vmax.f32 %v6028_v51, %v2623_v18  ;;  %v2725_v19 = vmax.f32 %v2532_v10, %v6030_v49  ;;  %3287 = vst.msk [vmem:[%s5109_s11 + $0x60] sm:$0xf] %vm3262_vm4, %v3709_v8  ;;  %v2626_v61 = vmax.f32 %v2434_v26, 0.0 }
 0x1f3   : >> { %2818 = vst.msk [vmem:[#allocation2 + $0x2b8] sm:$0xff] %vm2666_vm3, %v2786_v5  ;;  %v2341_v15 = vadd.f32 %v4479_v1, %v2143_v54  ;;  %v2437_v36 = vadd.f32 %v4479_v1, %v2239_v44  ;;  %v6031_v11 = vmax.f32 %v5292_v39, 0.0  ;;  %v2339_v47 = vadd.f32 %v4479_v1, %v2141_v57 }
 0x1f4   : >> { %2752 = vst.msk [vmem:[#allocation2 + $0x1a8] sm:$0xff] %vm2666_vm3, %v2720_v37  ;;  %2816 = vst.msk [vmem:[#allocation2 + $0x2a8] sm:$0xff] %vm2666_vm3, %v2784_v62  ;;  %v2435_v42 = vadd.f32 %v4479_v1, %v2237_v40  ;;  %v2146_v13 = vmul.f32 %v5662_v33, %v4474_v0  ;;  %v6033_v41 = vmax.f32 %v6032_v25, 0.0  ;;  %v6035_v31 = vmax.f32 %v6034_v4, 0.0  ;;  %v6036_v40 = vld [vmem:[#allocation25_spill] sm:$0xff]  ;;  %v6045_v4 = vld [vmem:[#allocation28_spill] sm:$0xff] }
 0x1f5   : >> { %3303 = vst.msk [vmem:[%s5109_s11 + $0xa0] sm:$0xf] %vm3262_vm4, %v3725_v17  ;;  %v2789_v20 = vmax.f32 %v6031_v11, %v2628_v48  ;;  %v2533_v54 = vmax.f32 %v2341_v15, 0.0  ;;  %v2629_v58 = vmax.f32 %v2437_v36, 0.0  ;;  %v2881_v38 = vld [vmem:[#allocation2 + $0x1b0] ss:$2 sm:$0xff]  ;;  %v2242_v57 = vmul.f32 %v5664_v24, %v4474_v0 }
 0x1f6   : >> { %2757 = vst.msk [vmem:[#allocation2 + $0x1d0] sm:$0xff] %vm2666_vm3, %v2725_v19  ;;  %v2723_v45 = vmax.f32 %v2530_v53, %v6033_v41  ;;  %v2787_v26 = vmax.f32 %v6035_v31, %v2626_v61  ;;  %v2977_v9 = vld [vmem:[#allocation2 + $0x1b1] ss:$2 sm:$0xff]  ;;  %v2531_v39 = vmax.f32 %v2339_v47, 0.0  ;;  %v2627_v46 = vmax.f32 %v2435_v42, 0.0  ;;  %v6043_v17 = vld [vmem:[#allocation27_spill] sm:$0xff] }
 0x1f7   : >> { %2821 = vst.msk [vmem:[#allocation2 + $0x2d0] sm:$0xff] %vm2666_vm3, %v2789_v20  ;;  %v2344_v44 = vadd.f32 %v4479_v1, %v2146_v13  ;;  %v3045_v33 = vmax.f32 %v2881_v38, %v2977_v9  ;;  %v6037_v6 = vmax.f32 %v6036_v40, 0.0  ;;  %v6039_v32 = vmax.f32 %v6038_v43, 0.0 }
 0x1f8   : >> { %2755 = vst.msk [vmem:[#allocation2 + $0x1c0] sm:$0xff] %vm2666_vm3, %v2723_v45  ;;  %2819 = vst.msk [vmem:[#allocation2 + $0x2c0] sm:$0xff] %vm2666_vm3, %v2787_v26  ;;  %v2144_v34 = vmul.f32 %v4474_v0, %v5675_v27  ;;  %v6041_v35 = vmax.f32 %v6040_v29, 0.0  ;;  %v6042_v10 = vmax.f32 %v5328_v2, 0.0  ;;  %v2440_v8 = vadd.f32 %v4479_v1, %v2242_v57 }
 0x1f9   : >> { %v2726_v60 = vmax.f32 %v2533_v54, %v6037_v6  ;;  %v2790_v28 = vmax.f32 %v6039_v32, %v2629_v58  ;;  %v2536_v12 = vmax.f32 %v2344_v44, 0.0  ;;  %v3712_v14 = vpack.c.bf16 %v3045_v33, %v3045_v33  ;;  %v6048_v58 = vld [vmem:[#allocation29_spill] sm:$0xff] }
 0x1fa   : >> { %v2724_v18 = vmax.f32 %v2531_v39, %v6041_v35  ;;  %v2788_v24 = vmax.f32 %v6042_v10, %v2627_v46  ;;  %v2342_v5 = vadd.f32 %v4479_v1, %v2144_v34  ;;  %v2240_v27 = vmul.f32 %v4474_v0, %v5677_v55  ;;  %v2913_v16 = vld [vmem:[#allocation2 + $0x2b0] ss:$2 sm:$0xff]  ;;  %v3009_v2 = vld [vmem:[#allocation2 + $0x2b1] ss:$2 sm:$0xff] }
 0x1fb   : >> { %2758 = vst.msk [vmem:[#allocation2 + $0x1d8] sm:$0xff] %vm2666_vm3, %v2726_v60  ;;  %2822 = vst.msk [vmem:[#allocation2 + $0x2d8] sm:$0xff] %vm2666_vm3, %v2790_v28  ;;  %v2147_v21 = vmul.f32 %v5693_v22, %v4474_v0  ;;  %v2879_v37 = vld [vmem:[#allocation2 + $0x1a0] ss:$2 sm:$0xff]  ;;  %v6044_v51 = vmax.f32 %v6043_v17, 0.0  ;;  %v2243_v59 = vmul.f32 %v5695_v56, %v4474_v0  ;;  %v2145_v49 = vmul.f32 %v4474_v0, %v5704_v50 }
 0x1fc   : >> { %2756 = vst.msk [vmem:[#allocation2 + $0x1c8] sm:$0xff] %vm2666_vm3, %v2724_v18  ;;  %2820 = vst.msk [vmem:[#allocation2 + $0x2c8] sm:$0xff] %vm2666_vm3, %v2788_v24  ;;  %v3061_v55 = vmax.f32 %v2913_v16, %v3009_v2  ;;  %v2975_v22 = vld [vmem:[#allocation2 + $0x1a1] ss:$2 sm:$0xff]  ;;  %v2911_v19 = vld [vmem:[#allocation2 + $0x2a0] ss:$2 sm:$0xff]  ;;  %v2438_v53 = vadd.f32 %v4479_v1, %v2240_v27  ;;  %v2241_v15 = vmul.f32 %v4474_v0, %v5706_v63 }
 0x1fd   : >> { %v2729_v62 = vmax.f32 %v2536_v12, %v6044_v51  ;;  %3290 = vst.msk [vmem:[%s5109_s11 + $0x6c] sm:$0xf] %vm3262_vm4, %v3712_v14  ;;  %v3007_v48 = vld [vmem:[#allocation2 + $0x2a1] ss:$2 sm:$0xff]  ;;  %v2345_v61 = vadd.f32 %v4479_v1, %v2147_v21  ;;  %v3044_v36 = vmax.f32 %v2879_v37, %v2975_v22  ;;  %v2632_v56 = vmax.f32 %v2440_v8, 0.0 }
 0x1fe   : >> { %v3060_v11 = vmax.f32 %v2911_v19, %v3007_v48  ;;  %v2534_v50 = vmax.f32 %v2342_v5, 0.0  ;;  %v3728_v20 = vpack.c.bf16 %v3061_v55, %v3061_v55  ;;  %v2630_v47 = vmax.f32 %v2438_v53, 0.0  ;;  %v6051_v14 = vld [vmem:[#allocation30_spill] sm:$0xff] }
 0x1ff   : >> { %2761 = vst.msk [vmem:[#allocation2 + $0x1f0] sm:$0xff] %vm2666_vm3, %v2729_v62  ;;  %v2537_v42 = vmax.f32 %v2345_v61, 0.0  ;;  %v2441_v13 = vadd.f32 %v4479_v1, %v2243_v59  ;;  %v3711_v25 = vpack.c.bf16 %v3044_v36, %v3044_v36  ;;  %v2793_v45 = vmax.f32 %v2600_v52, %v2632_v56 }
 0x200   : >> { %v3727_v41 = vpack.c.bf16 %v3060_v11, %v3060_v11  ;;  %v6046_v63 = vmax.f32 %v6045_v4, 0.0  ;;  %3306 = vst.msk [vmem:[%s5109_s11 + $0xac] sm:$0xf] %vm3262_vm4, %v3728_v20  ;;  %v6047_v26 = vmax.f32 %v5340_v3, 0.0  ;;  %v6049_v38 = vmax.f32 %v6048_v58, 0.0 }
 0x201   : >> { %v2633_v39 = vmax.f32 %v2441_v13, 0.0  ;;  %v2343_v46 = vadd.f32 %v4479_v1, %v2145_v49  ;;  %3289 = vst.msk [vmem:[%s5109_s11 + $0x68] sm:$0xf] %vm3262_vm4, %v3711_v25  ;;  %v2439_v3 = vadd.f32 %v4479_v1, %v2241_v15  ;;  %v6050_v60 = vmax.f32 %v5365_v30, 0.0 }
 0x202   : >> { %v2727_v31 = vmax.f32 %v2534_v50, %v6046_v63  ;;  %v2791_v54 = vmax.f32 %v6047_v26, %v2630_v47  ;;  %v2730_v9 = vmax.f32 %v2537_v42, %v6049_v38  ;;  %3305 = vst.msk [vmem:[%s5109_s11 + $0xa8] sm:$0xf] %vm3262_vm4, %v3727_v41  ;;  %v2885_v7 = vld [vmem:[#allocation2 + $0x1d0] ss:$2 sm:$0xff]  ;;  %v2981_v52 = vld [vmem:[#allocation2 + $0x1d1] ss:$2 sm:$0xff] }
 0x203   : >> { %v2917_v44 = vld [vmem:[#allocation2 + $0x2d0] ss:$2 sm:$0xff]  ;;  %2825 = vst.msk [vmem:[#allocation2 + $0x2f0] sm:$0xff] %vm2666_vm3, %v2793_v45  ;;  %v3047_v57 = vmax.f32 %v2885_v7, %v2981_v52  ;;  %v3013_v33 = vld [vmem:[#allocation2 + $0x2d1] ss:$2 sm:$0xff]  ;;  %v2794_v43 = vmax.f32 %v6050_v60, %v2633_v39  ;;  %v2535_v35 = vmax.f32 %v2343_v46, 0.0 }
 0x204   : >> { %2759 = vst.msk [vmem:[#allocation2 + $0x1e0] sm:$0xff] %vm2666_vm3, %v2727_v31  ;;  %v2883_v40 = vld [vmem:[#allocation2 + $0x1c0] ss:$2 sm:$0xff]  ;;  %v2979_v6 = vld [vmem:[#allocation2 + $0x1c1] ss:$2 sm:$0xff]  ;;  %2823 = vst.msk [vmem:[#allocation2 + $0x2e0] sm:$0xff] %vm2666_vm3, %v2791_v54  ;;  %v3063_v32 = vmax.f32 %v2917_v44, %v3013_v33 }
 0x205   : >> { %2762 = vst.msk [vmem:[#allocation2 + $0x1f8] sm:$0xff] %vm2666_vm3, %v2730_v9  ;;  %v3046_v28 = vmax.f32 %v2883_v40, %v2979_v6  ;;  %v2915_v34 = vld [vmem:[#allocation2 + $0x2c0] ss:$2 sm:$0xff]  ;;  %v3011_v29 = vld [vmem:[#allocation2 + $0x2c1] ss:$2 sm:$0xff]  ;;  %v2631_v18 = vmax.f32 %v2439_v3, 0.0  ;;  %v3714_v10 = vpack.c.bf16 %v3047_v57, %v3047_v57 }
 0x206   : >> { %v3062_v24 = vmax.f32 %v2915_v34, %v3011_v29  ;;  %2826 = vst.msk [vmem:[#allocation2 + $0x2f8] sm:$0xff] %vm2666_vm3, %v2794_v43  ;;  %v3730_v12 = vpack.c.bf16 %v3063_v32, %v3063_v32  ;;  %v6052_v5 = vmax.f32 %v6051_v14, 0.0  ;;  %v6053_v30 = vmax.f32 %v5369_v23, 0.0 }
 0x207   : >> { %v3713_v8 = vpack.c.bf16 %v3046_v28, %v3046_v28  ;;  %3292 = vst.msk [vmem:[%s5109_s11 + $0x74] sm:$0xf] %vm3262_vm4, %v3714_v10 }
 0x208   : >> { %v2728_v27 = vmax.f32 %v2535_v35, %v6052_v5  ;;  %v2792_v21 = vmax.f32 %v6053_v30, %v2631_v18  ;;  %v3729_v16 = vpack.c.bf16 %v3062_v24, %v3062_v24  ;;  %3308 = vst.msk [vmem:[%s5109_s11 + $0xb4] sm:$0xf] %vm3262_vm4, %v3730_v12 }
 0x209   : >> { %3291 = vst.msk [vmem:[%s5109_s11 + $0x70] sm:$0xf] %vm3262_vm4, %v3713_v8 }
 0x20a   : >> { %2760 = vst.msk [vmem:[#allocation2 + $0x1e8] sm:$0xff] %vm2666_vm3, %v2728_v27  ;;  %2824 = vst.msk [vmem:[#allocation2 + $0x2e8] sm:$0xff] %vm2666_vm3, %v2792_v21 }
 0x20b   : >> { %3307 = vst.msk [vmem:[%s5109_s11 + $0xb0] sm:$0xf] %vm3262_vm4, %v3729_v16 }
 0x20c   : >> { %v2889_v2 = vld [vmem:[#allocation2 + $0x1f0] ss:$2 sm:$0xff]  ;;  %v2985_v37 = vld [vmem:[#allocation2 + $0x1f1] ss:$2 sm:$0xff] }
 0x20d   : >> { %v3049_v17 = vmax.f32 %v2889_v2, %v2985_v37  ;;  %v2921_v23 = vld [vmem:[#allocation2 + $0x2f0] ss:$2 sm:$0xff]  ;;  %v3017_v51 = vld [vmem:[#allocation2 + $0x2f1] ss:$2 sm:$0xff] }
 0x20e   : >> { %v3065_v59 = vmax.f32 %v2921_v23, %v3017_v51 }
 0x20f   : >> { %v3716_v62 = vpack.c.bf16 %v3049_v17, %v3049_v17 }
 0x210   : >> { %v3732_v49 = vpack.c.bf16 %v3065_v59, %v3065_v59 }
 0x211   : >> { %3294 = vst.msk [vmem:[%s5109_s11 + $0x7c] sm:$0xf] %vm3262_vm4, %v3716_v62  ;;  %v2887_v55 = vld [vmem:[#allocation2 + $0x1e0] ss:$2 sm:$0xff]  ;;  %v2983_v22 = vld [vmem:[#allocation2 + $0x1e1] ss:$2 sm:$0xff] }
 0x212   : >> { %v2919_v19 = vld [vmem:[#allocation2 + $0x2e0] ss:$2 sm:$0xff]  ;;  %v3048_v48 = vmax.f32 %v2887_v55, %v2983_v22  ;;  %v3015_v53 = vld [vmem:[#allocation2 + $0x2e1] ss:$2 sm:$0xff]  ;;  %3310 = vst.msk [vmem:[%s5109_s11 + $0xbc] sm:$0xf] %vm3262_vm4, %v3732_v49 }
 0x213   : >> { %v3064_v61 = vmax.f32 %v2919_v19, %v3015_v53  ;;  %256 = sbr.rel (!%p254_p7) target bundleno = 66 (0x42), region = 180 }
 0x214   : >> { %v3715_v15 = vpack.c.bf16 %v3048_v48, %v3048_v48 }
 0x215   : >> { %v3731_v36 = vpack.c.bf16 %v3064_v61, %v3064_v61 }
 0x216   : >> { %3293 = vst.msk [vmem:[%s5109_s11 + $0x78] sm:$0xf] %vm3262_vm4, %v3715_v15 }
 0x217   : >> { %3309 = vst.msk [vmem:[%s5109_s11 + $0xb8] sm:$0xf] %vm3262_vm4, %v3731_v36 }
 0x21a PF: > { %s17_s22 = sadd.s32 1, %s4316_s22   ;;  %s6054_s15 = smov %s4292_s16 }
 0x21b   : > { %p14_p6 = scmp.ge.s32.totalorder %s17_s22, 14   ;;  %s6055_s16 = smov %s4296_s17 }
 0x21c   : > { %s6056_s17 = smov %s4417_s8  ;;  %s6057_s18 = smov %s4308_s20 }
 0x21d   : > { %s6058_s19 = smov %s4312_s21  ;;  %s6059_s20 = smov %s6062_s24 }
 0x21e   : > { %s6060_s21 = smov %s6066_s25  ;;  %16 = sbr.rel (!%p14_p6) target bundleno = 5 (0x5), region = 191 }
 0x225   :  { %3343 = vsyncpa [#allocation4], 1 }
 0x226   :  { %3345 = vsyncpa [#allocation4 + $0x1], 1 }

</bundles_post_ra>
